<compile_context>
chip_gen: v5e
topology: v5e:2x2
jax: 0.10.0
libtpu: 0.0.40
codegen_flags: <defaults>
</compile_context>

<pallas_src>
import jax
import jax.numpy as jnp
from jax.experimental import pallas as pl
from jax.experimental.pallas import tpu as pltpu

NUM_BRANCHES = 5
HID = 512        # per-branch feature width (5 * 512 = 2560 -> fc in_features)
OUT = 2          # fc out_features
OUT_PAD = 128    # lane-dense padded output width (zero-padded fc columns)


def mldrnet_kernel(x_ref, wb_ref, bb_ref, wfc_ref, bfc_ref, o_ref, acc_ref):
    """Grid axis 0 iterates over the 5 branches (reduction); acc_ref is VMEM."""
    i = pl.program_id(0)

    @pl.when(i == 0)
    def _init():
        acc_ref[...] = jnp.broadcast_to(bfc_ref[...], acc_ref.shape)

    # branch i: Linear(F -> 512) + ReLU.  bf16 operands, f32 MXU accumulation.
    h = jnp.dot(x_ref[...], wb_ref[...], preferred_element_type=jnp.float32)
    h = jnp.maximum(h + bb_ref[...], 0.0)

    # contribution of branch i's 512-wide slice of the (2560, OUT) fc weight.
    # wfc_ref holds all 5 (zero-padded) slices resident in VMEM; dynamic index
    # along the leading axis avoids a per-step DMA.
    acc_ref[...] += jnp.dot(h, wfc_ref[i], preferred_element_type=jnp.float32)

    # single lane-dense HBM writeback on the last branch.
    @pl.when(i == pl.num_programs(0) - 1)
    def _finalize():
        o_ref[...] = acc_ref[...]


def mldrnet_forward(x_flat, w_br, b_br, w_fc, b_fc):
    """x_flat: (5, B, F); w_br: (5, F, 512); b_br: (5, 1, 512);
       w_fc: (5, 512, 2);  b_fc: (1, 2)  ->  (B, 2) float32."""
    n_br, B, F = x_flat.shape

    # Stream the two large operands in bf16 (kernel is HBM-bound on Wb / x).
    x_bf16 = x_flat.astype(jnp.bfloat16)
    w_br_bf16 = w_br.astype(jnp.bfloat16)
    b_br_f32 = b_br.astype(jnp.float32)

    # Zero-pad the fc weight / bias to a lane-dense 128-wide output slab.
    w_fc_pad = jnp.zeros((n_br, HID, OUT_PAD), jnp.float32)
    w_fc_pad = w_fc_pad.at[..., :OUT].set(w_fc.astype(jnp.float32))
    b_fc_pad = jnp.zeros((1, OUT_PAD), jnp.float32)
    b_fc_pad = b_fc_pad.at[:, :OUT].set(b_fc.astype(jnp.float32))

    bytes_accessed = (x_bf16.size * 2 + w_br_bf16.size * 2 + b_br_f32.size * 4
                      + w_fc_pad.size * 4 + b_fc_pad.size * 4 + B * OUT_PAD * 4)
    flops = 2 * n_br * B * F * HID + 2 * n_br * B * HID * OUT_PAD

    out_pad = pl.pallas_call(
        mldrnet_kernel,
        out_shape=jax.ShapeDtypeStruct((B, OUT_PAD), jnp.float32),
        grid_spec=pltpu.PrefetchScalarGridSpec(
            num_scalar_prefetch=0,
            grid=(n_br,),
            in_specs=[
                pl.BlockSpec((None, B, F), lambda i: (i, 0, 0)),         # x[i]  (bf16)
                pl.BlockSpec((None, F, HID), lambda i: (i, 0, 0)),       # Wb[i] (bf16)
                pl.BlockSpec((None, 1, HID), lambda i: (i, 0, 0)),       # bb[i] (f32)
                pl.BlockSpec((n_br, HID, OUT_PAD), lambda i: (0, 0, 0)), # Wfc (all, once)
                pl.BlockSpec((1, OUT_PAD), lambda i: (0, 0)),            # bfc (once)
            ],
            out_specs=pl.BlockSpec((B, OUT_PAD), lambda i: (0, 0)),
            scratch_shapes=[pltpu.VMEM((B, OUT_PAD), jnp.float32)],
        ),
        compiler_params=pltpu.CompilerParams(
            dimension_semantics=("arbitrary",)),   # branch axis is a reduction
        cost_estimate=pl.CostEstimate(
            flops=flops, transcendentals=0, bytes_accessed=bytes_accessed),
    )(x_bf16, w_br_bf16, b_br_f32, w_fc_pad, b_fc_pad)

    return out_pad[:, :OUT]


def ref_forward(x_flat, w_br, b_br, w_fc, b_fc):
    """Pure-JAX reference mirroring the PyTorch forward (cat -> view -> fc),
    with the same bf16 streaming / f32 accumulation as the kernel."""
    x_bf16 = x_flat.astype(jnp.bfloat16)
    w_br_bf16 = w_br.astype(jnp.bfloat16)
    brhs = []
    for i in range(NUM_BRANCHES):
        h = jnp.dot(x_bf16[i], w_br_bf16[i], preferred_element_type=jnp.float32)
        h = jnp.maximum(h + b_br[i], 0.0)                      # (B, 512)
        brhs.append(h)
    flat = jnp.concatenate(brhs, axis=-1)                      # (B, 2560)
    return flat @ w_fc.reshape(NUM_BRANCHES * HID, OUT) + b_fc


if __name__ == "__main__":
    B, C, H, W = 2, 4, 16, 16
    F = C * H * W  # 1024

    key = jax.random.PRNGKey(0)
    kx, kwb, kbb, kwf, kbf = jax.random.split(key, 5)

    # inputs: x has the same leading "branch" axis as the PyTorch x[i] indexing
    x = jax.random.normal(kx, (NUM_BRANCHES, B, C, H, W), jnp.float32)
    x_flat = x.reshape(NUM_BRANCHES, B, F)

    # deterministic synthetic parameters
    w_br = 0.02 * jax.random.normal(kwb, (NUM_BRANCHES, F, HID), jnp.float32)
    b_br = 0.02 * jax.random.normal(kbb, (NUM_BRANCHES, 1, HID), jnp.float32)
    w_fc = 0.02 * jax.random.normal(kwf, (NUM_BRANCHES, HID, OUT), jnp.float32)
    b_fc = 0.02 * jax.random.normal(kbf, (1, OUT), jnp.float32)

    out = mldrnet_forward(x_flat, w_br, b_br, w_fc, b_fc)
    out = jax.block_until_ready(out)

    ref = ref_forward(x_flat, w_br, b_br, w_fc, b_fc)
    assert out.shape == (B, OUT)
    assert jnp.allclose(out, ref, rtol=2e-2, atol=2e-2), (out, ref)

    print("KERNEL_OK")
</pallas_src>

<mosaic_0001>
module attributes {stable_mosaic.version = 11 : i64} {
  func.func @mldrnet_kernel(%arg0: i32, %arg1: memref<1x2x1024xbf16, #tpu.memory_space<vmem>>, %arg2: memref<1x1024x512xbf16, #tpu.memory_space<vmem>>, %arg3: memref<1x1x512xf32, #tpu.memory_space<vmem>>, %arg4: memref<5x512x128xf32, #tpu.memory_space<vmem>>, %arg5: memref<1x128xf32, #tpu.memory_space<vmem>>, %arg6: memref<2x128xf32, #tpu.memory_space<vmem>>, %arg7: memref<2x128xf32, #tpu.memory_space<vmem>>) attributes {dimension_semantics = [#tpu.dimension_semantics<arbitrary>], iteration_bounds = array<i64: 5>, scalar_prefetch = 0 : i64, scratch_operands = 1 : i64, tpu.core_type = #tpu.core_type<tc>, window_params = [{transform_indices = @transform_0, window_bounds = array<i64: 1, 2, 1024>}, {transform_indices = @transform_1, window_bounds = array<i64: 1, 1024, 512>}, {transform_indices = @transform_2, window_bounds = array<i64: 1, 1, 512>}, {pipeline_mode = #tpu.pipeline_mode<synchronous>, transform_indices = @transform_3, window_bounds = array<i64: 5, 512, 128>}, {pipeline_mode = #tpu.pipeline_mode<synchronous>, transform_indices = @transform_4, window_bounds = array<i64: 1, 128>}, {pipeline_mode = #tpu.pipeline_mode<synchronous>, transform_indices = @transform_5, window_bounds = array<i64: 2, 128>}]} {
    %c0_i32 = arith.constant 0 : i32
    %0 = arith.cmpi eq, %arg0, %c0_i32 : i32
    %1 = arith.extui %0 : i1 to i32
    %c0_i32_0 = arith.constant 0 : i32
    %2 = arith.cmpi ne, %1, %c0_i32_0 : i32
    scf.if %2 {
      %c0_18 = arith.constant 0 : index
      %c0_19 = arith.constant 0 : index
      %24 = vector.load %arg5[%c0_18, %c0_19] : memref<1x128xf32, #tpu.memory_space<vmem>>, vector<1x128xf32>
      %25 = vector.shape_cast %24 : vector<1x128xf32> to vector<1x128xf32>
      %26 = vector.broadcast %25 : vector<1x128xf32> to vector<2x128xf32>
      %c0_20 = arith.constant 0 : index
      %c0_21 = arith.constant 0 : index
      %27 = vector.load %arg7[%c0_20, %c0_21] : memref<2x128xf32, #tpu.memory_space<vmem>>, vector<2x128xf32>
      tpu.vector_store %arg7[%c0_20, %c0_21], %26 {strides = array<i32>} : memref<2x128xf32, #tpu.memory_space<vmem>>, vector<2x128xf32>,
    } else {
    }
    %c0 = arith.constant 0 : index
    %c0_1 = arith.constant 0 : index
    %c0_2 = arith.constant 0 : index
    %3 = vector.load %arg1[%c0, %c0_1, %c0_2] : memref<1x2x1024xbf16, #tpu.memory_space<vmem>>, vector<1x2x1024xbf16>
    %4 = vector.shape_cast %3 : vector<1x2x1024xbf16> to vector<2x1024xbf16>
    %c0_3 = arith.constant 0 : index
    %c0_4 = arith.constant 0 : index
    %c0_5 = arith.constant 0 : index
    %5 = vector.load %arg2[%c0_3, %c0_4, %c0_5] : memref<1x1024x512xbf16, #tpu.memory_space<vmem>>, vector<1x1024x512xbf16>
    %6 = vector.shape_cast %5 : vector<1x1024x512xbf16> to vector<1024x512xbf16>
    %cst = arith.constant dense<0.000000e+00> : vector<2x512xf32>
    %7 = tpu.matmul %4, %6, %cst {dimension_numbers = #tpu.dot_dimension_numbers<[1], [0], [0], [1], [0, 0, 1, 1], [], []>} : vector<2x1024xbf16>, vector<1024x512xbf16>, vector<2x512xf32> -> vector<2x512xf32>
    %c0_6 = arith.constant 0 : index
    %c0_7 = arith.constant 0 : index
    %c0_8 = arith.constant 0 : index
    %8 = vector.load %arg3[%c0_6, %c0_7, %c0_8] : memref<1x1x512xf32, #tpu.memory_space<vmem>>, vector<1x1x512xf32>
    %9 = vector.shape_cast %8 : vector<1x1x512xf32> to vector<1x512xf32>
    %10 = vector.broadcast %9 : vector<1x512xf32> to vector<2x512xf32>
    %11 = arith.addf %7, %10 : vector<2x512xf32>
    %cst_9 = arith.constant 0.000000e+00 : f32
    %12 = vector.broadcast %cst_9 : f32 to vector<2x512xf32>
    %13 = arith.maximumf %11, %12 : vector<2x512xf32>
    %c0_10 = arith.constant 0 : index
    %c0_11 = arith.constant 0 : index
    %14 = vector.load %arg7[%c0_10, %c0_11] : memref<2x128xf32, #tpu.memory_space<vmem>>, vector<2x128xf32>
    %15 = arith.index_cast %arg0 : i32 to index
    %c0_12 = arith.constant 0 : index
    %c0_13 = arith.constant 0 : index
    %16 = vector.load %arg4[%15, %c0_12, %c0_13] : memref<5x512x128xf32, #tpu.memory_space<vmem>>, vector<1x512x128xf32>
    %17 = vector.shape_cast %16 : vector<1x512x128xf32> to vector<512x128xf32>
    %cst_14 = arith.constant dense<0.000000e+00> : vector<2x128xf32>
    %18 = tpu.matmul %13, %17, %cst_14 {dimension_numbers = #tpu.dot_dimension_numbers<[1], [0], [0], [1], [0, 0, 1, 1], [], []>} : vector<2x512xf32>, vector<512x128xf32>, vector<2x128xf32> -> vector<2x128xf32>
    %19 = arith.addf %14, %18 : vector<2x128xf32>
    %c0_15 = arith.constant 0 : index
    %c0_16 = arith.constant 0 : index
    %20 = vector.load %arg7[%c0_15, %c0_16] : memref<2x128xf32, #tpu.memory_space<vmem>>, vector<2x128xf32>
    tpu.vector_store %arg7[%c0_15, %c0_16], %19 {strides = array<i32>} : memref<2x128xf32, #tpu.memory_space<vmem>>, vector<2x128xf32>,
    %c4_i32 = arith.constant 4 : i32
    %21 = arith.cmpi eq, %arg0, %c4_i32 : i32
    %22 = arith.extui %21 : i1 to i32
    %c0_i32_17 = arith.constant 0 : i32
    %23 = arith.cmpi ne, %22, %c0_i32_17 : i32
    scf.if %23 {
      %c0_18 = arith.constant 0 : index
      %c0_19 = arith.constant 0 : index
      %24 = vector.load %arg7[%c0_18, %c0_19] : memref<2x128xf32, #tpu.memory_space<vmem>>, vector<2x128xf32>
      %c0_20 = arith.constant 0 : index
      %c0_21 = arith.constant 0 : index
      %25 = vector.load %arg6[%c0_20, %c0_21] : memref<2x128xf32, #tpu.memory_space<vmem>>, vector<2x128xf32>
      tpu.vector_store %arg6[%c0_20, %c0_21], %24 {strides = array<i32>} : memref<2x128xf32, #tpu.memory_space<vmem>>, vector<2x128xf32>,
    } else {
    }
    return
  }
  func.func @transform_0(%arg0: i32) -> (i32, i32, i32) {
    %c0_i32 = arith.constant 0 : i32
    %c0_i32_0 = arith.constant 0 : i32
    %c0_i32_1 = arith.constant 0 : i32
    return %arg0, %c0_i32, %c0_i32_0 : i32, i32, i32
  }
  func.func @transform_1(%arg0: i32) -> (i32, i32, i32) {
    %c0_i32 = arith.constant 0 : i32
    %c0_i32_0 = arith.constant 0 : i32
    %c0_i32_1 = arith.constant 0 : i32
    return %arg0, %c0_i32, %c0_i32_0 : i32, i32, i32
  }
  func.func @transform_2(%arg0: i32) -> (i32, i32, i32) {
    %c0_i32 = arith.constant 0 : i32
    %c0_i32_0 = arith.constant 0 : i32
    %c0_i32_1 = arith.constant 0 : i32
    return %arg0, %c0_i32, %c0_i32_0 : i32, i32, i32
  }
  func.func @transform_3(%arg0: i32) -> (i32, i32, i32) {
    %c0_i32 = arith.constant 0 : i32
    %c0_i32_0 = arith.constant 0 : i32
    %c0_i32_1 = arith.constant 0 : i32
    %c0_i32_2 = arith.constant 0 : i32
    return %c0_i32, %c0_i32_0, %c0_i32_1 : i32, i32, i32
  }
  func.func @transform_4(%arg0: i32) -> (i32, i32) {
    %c0_i32 = arith.constant 0 : i32
    %c0_i32_0 = arith.constant 0 : i32
    %c0_i32_1 = arith.constant 0 : i32
    return %c0_i32, %c0_i32_0 : i32, i32
  }
  func.func @transform_5(%arg0: i32) -> (i32, i32) {
    %c0_i32 = arith.constant 0 : i32
    %c0_i32_0 = arith.constant 0 : i32
    %c0_i32_1 = arith.constant 0 : i32
    return %c0_i32, %c0_i32_0 : i32, i32
  }
}

</mosaic_0001>

<bundles_post_ra>
// kernel: tpu_custom_call.1
= control target key start
LH: loop header
LB: loop body
LE: loop exit
PB: predicated region body
PF: predicated region fallthrough
CT: control target
= control target key end

     0   :  { %s5097_s0 = inlined_call_operand.hbm [shape: bf16[5,2,1024], index: 0, kind: input, shape index: {}]   ;;  %s5098_s1 = inlined_call_operand.hbm [shape: bf16[5,1024,512], index: 1, kind: input, shape index: {}]   ;;  %s5099_s2 = inlined_call_operand.hbm [shape: f32[5,1,512], index: 2, kind: input, shape index: {}]   ;;  %s5100_s3 = inlined_call_operand.hbm [shape: f32[5,512,128], index: 3, kind: input, shape index: {}]   ;;  %s5101_s4 = inlined_call_operand.hbm [shape: f32[1,128], index: 4, kind: input, shape index: {}]   ;;  %s5102_s5 = inlined_call_operand.hbm [shape: f32[2,128], index: 5, kind: output, shape index: {}]  }
   0x1   :  { %5103 = sst [smem:[#allocation18_spill]] %s5098_s1 }
   0x2   :  { %5104 = sst [smem:[#allocation19_spill]] %s5100_s3 }
   0x3   :  { %10 = vsyncpa [#allocation4], 0 }
   0x4   :  { %12 = vsyncpa [#allocation4 + $0x1], 0 }
   0x5   :  { %13 = vsyncpa [#allocation7], 0 }
   0x6   :  { %15 = vsyncpa [#allocation7 + $0x1], 0 }
   0x7   :  { %16 = vsyncpa [#allocation10], 0 }
   0x8   :  { %17 = vsyncpa [#allocation5], 0  ;;  %s4271_s18 = smov 0   ;;  %s4273_s19 = smov 0  }
   0x9   :  { %s4275_s20 = smov 0   ;;  %s4277_s21 = smov 0  }
   0xa LB: > { %s4290_s22 = sadd.s32 4294967295, %s4232_s21   ;;  %p43_p0 = scmp.ne.s32.totalorder %s4224_s19, %s4220_s18  ;;  %s4232_s21 = sphi %s4277_s21, %s5116_s21   ;;  %s4228_s20 = sphi %s4275_s20, %s5115_s20   ;;  %s4224_s19 = sphi %s4273_s19, %s5114_s19   ;;  %s4220_s18 = sphi %s4271_s18, %s5113_s18  }
   0xb   : > { %p44_p1 = scmp.eq.s32.totalorder %s4290_s22, 0  ;;  %p2612_p2 = scmp.ge.s32.totalorder %s4232_s21, 1 }
   0xc   : > { %p169_p3 = scmp.lt.s32.totalorder %s4232_s21, 6  ;;  %p2613_p4 = scmp.ne.s32.totalorder %s4290_s22, 0 }
   0xd   : > { %p4299_p5 = por %p44_p1, %p43_p0  ;;  %s5106_s3 = sld [smem:[#allocation19_spill]] }
   0xe   : > { %p4306_p6 = pnand %p2612_p2, %p169_p3  ;;  %s4234_s28 = smov [#allocation9]  }
   0xf   : > { %s182_s29 = sshll.u32 %s4234_s28, 4  ;;  %s4319_s6 = sadd.s32 1, %s4232_s21   ;;  %s183_s29 = int_to_ptr.vmem [resolvable:$true] %s182_s29 }
  0x10   : > { %p3935_p7 = pneg %p4306_p6  ;;  %s4235_s7 = smov 128  }
  0x11   : > { %s4236_s8 = smov 8   ;;  %s27_s9 = ssub.s32 %s4232_s21, %s4319_s6 }
  0x12   : > { %p4314_p8 = pnand %p3935_p7, %p44_p1  ;;  %s30_s10 = sadd.s32 1, %s4228_s20 }
  0x13   : > { %s180_s26 = sshll.u32 %s5106_s3, 4  ;;  %p28_p9 = scmp.eq.s32.totalorder %s27_s9, 0  ;;  %s181_s26 = int_to_ptr.hbm [resolvable:$true] %s180_s26 }
  0x14   : > { %3938 = dma.hbm_to_vmem [thread:$0]  (!%p4314_p8), %s181_s26, 40960, %s183_s29, [#allocation10], %s4235_s7, %s4235_s7, %s4236_s8  }
  0x15   : > { %p37_p10 = scmp.ne.s32.totalorder %s4228_s20, %s4224_s19  ;;  %p38_p11 = scmp.eq.s32.totalorder %s4232_s21, 0 }
  0x16   : > { %p3954_p12 = scmp.lt.s32.totalorder %s4232_s21, 5  ;;  %s4334_s12 = sand.u32 1, %s4228_s20  }
  0x17   : > { %s4331_s11 = scalar_select %p28_p9, %s4228_s20, %s30_s10  }
  0x18   : > { %p39_p13 = por %p38_p11, %p37_p10  ;;  %s227_s13 = sand.u32 1, %s4232_s21  }
  0x19   : > { %5109 = sst [smem:[#allocation17_spill]] %s4331_s11  ;;  %s2618_s14 = sshll.u32 %s4334_s12, 11 }
  0x1a   : > { %p4338_p0 = pnand %p3954_p12, %p39_p13  ;;  %s3660_s16 = sshll.u32 %s4232_s21, 11 }
  0x1b   : > { %s5111_s1 = sld [smem:[#allocation18_spill]]  ;;  %s231_s26 = scalar_lea.vmem [#allocation6], %s2618_s14 }
  0x1c   : > { %s239_s28 = sshll.u32 %s231_s26, 4  ;;  %s4346_s29 = scalar_lea.sflag [#allocation7], %s227_s13  ;;  %s240_s28 = int_to_ptr.vmem [resolvable:$true] %s239_s28 }
  0x1d   : > { %p4042_p3 = pneg %p4338_p0 }
  0x21   : > { %s236_s24 = scalar_lea.hbm %s5111_s1, %s3660_s16  ;;  %s4045_s16 = scalar_lea.hbm %s5111_s1, 10240 }
  0x22   : > { %s237_s25 = sshll.u32 %s236_s24, 4  ;;  %s238_s25 = int_to_ptr.hbm [resolvable:$true] %s237_s25 }
  0x23   : > { %s4038_s7 = sshra.s32 %s238_s25, 4  ;;  %s4039_s7 = int_to_ptr.hbm [resolvable:$true] %s4038_s7 }
  0x24   : > { %s4040_s8 = scalar_lea.hbm %s4039_s7, 2048  ;;  %p4046_p10 = scmp.lt.s32.totalorder %s4039_s7, %s5111_s1 }
  0x25   : > { %p4041_p2 = scmp.ne.s32.totalorder %s4039_s7, %s4040_s8  ;;  %p4047_p11 = scmp.lt.s32.totalorder %s4045_s16, %s4040_s8 }
  0x27   : > { %p4043_p7 = pnand %p4042_p3, %p4041_p2  ;;  %p4048_p12 = por %p4047_p11, %p4046_p10 }
  0x29   : > { %p4044_p9 = pneg %p4043_p7 }
  0x2b   : > { %p4049_p13 = pnand %p4048_p12, %p4044_p9 }
  0x2d   : > { %4052 = shalt.err (!%p4049_p13)
}
  0x2e   : > { %s4237_s13 = smov 256   ;;  %s4238_s18 = smov 16  }
  0x2f   : > { %3948 = dma.hbm_to_vmem [thread:$0]  (!%p4338_p0), %s238_s25, 32768, %s240_s28, %s4346_s29, %s4237_s13, %s4237_s13, %s4238_s18  }
  0x30   : > { %s195_s9 = sshll.u32 %s5101_s4, 4  ;;  %s4239_s7 = smov [#allocation11]   ;;  %s196_s9 = int_to_ptr.hbm [resolvable:$true] %s195_s9 }
  0x31   : > { %s197_s8 = sshll.u32 %s4239_s7, 4  ;;  %s2616_s10 = sshll.u32 %s4334_s12, 3  ;;  %s198_s8 = int_to_ptr.vmem [resolvable:$true] %s197_s8 }
  0x32   : > { %3941 = dma.hbm_to_vmem [thread:$0]  (!%p4314_p8), %s196_s9, 16, %s198_s8, [#allocation10]  }
  0x33   : > { %s2617_s16 = sshll.u32 %s4232_s21, 3  ;;  %s212_s11 = scalar_lea.vmem [#allocation3], %s2616_s10 }
  0x34   : > { %s216_s1 = scalar_lea.hbm %s5097_s0, %s2617_s16  ;;  %s220_s25 = sshll.u32 %s212_s11, 4  ;;  %s221_s25 = int_to_ptr.vmem [resolvable:$true] %s220_s25 }
  0x35   : > { %s218_s3 = sshll.u32 %s216_s1, 4  ;;  %s209_s28 = scalar_lea.sflag [#allocation4], %s4334_s12  ;;  %s219_s3 = int_to_ptr.hbm [resolvable:$true] %s218_s3 }
  0x36   : > { %s4098_s13 = sshra.s32 %s219_s3, 4  ;;  %s4105_s26 = scalar_lea.hbm %s5097_s0, 40  ;;  %s4099_s13 = int_to_ptr.hbm [resolvable:$true] %s4098_s13 }
  0x37   : > { %s4100_s18 = scalar_lea.hbm %s4099_s13, 8  ;;  %p4106_p9 = scmp.lt.s32.totalorder %s4099_s13, %s5097_s0 }
  0x38   : > { %p4101_p2 = scmp.ne.s32.totalorder %s4099_s13, %s4100_s18  ;;  %p4107_p10 = scmp.lt.s32.totalorder %s4105_s26, %s4100_s18 }
  0x3a   : > { %p4103_p7 = pnand %p4101_p2, %p4042_p3  ;;  %p4108_p11 = por %p4107_p10, %p4106_p9 }
  0x3c   : > { %p4104_p8 = pneg %p4103_p7 }
  0x3e   : > { %p4109_p12 = pnand %p4108_p11, %p4104_p8 }
  0x40   : > { %4112 = shalt.err (!%p4109_p12)
}
  0x41   : > { %3945 = dma.hbm_to_vmem [thread:$0]  (!%p4338_p0), %s219_s3, 128, %s221_s25, %s209_s28  }
  0x42   : > { %s2621_s1 = sshll.u32 %s4334_s12, 2  ;;  %s2622_s11 = sshll.u32 %s4232_s21, 2 }
  0x43   : > { %s257_s16 = scalar_lea.hbm %s5099_s2, %s2622_s11  ;;  %s253_s17 = scalar_lea.vmem [#allocation8], %s2621_s1 }
  0x44   : > { %s259_s14 = sshll.u32 %s257_s16, 4  ;;  %s261_s30 = sshll.u32 %s253_s17, 4  ;;  %s260_s14 = int_to_ptr.hbm [resolvable:$true] %s259_s14  ;;  %s262_s30 = int_to_ptr.vmem [resolvable:$true] %s261_s30 }
  0x45   : > { %s4128_s13 = sshra.s32 %s260_s14, 4  ;;  %s4135_s21 = scalar_lea.hbm %s5099_s2, 20  ;;  %s4129_s13 = int_to_ptr.hbm [resolvable:$true] %s4128_s13 }
  0x46   : > { %s4130_s18 = scalar_lea.hbm %s4129_s13, 4  ;;  %p4136_p8 = scmp.lt.s32.totalorder %s4129_s13, %s5099_s2 }
  0x47   : > { %p4131_p13 = scmp.ne.s32.totalorder %s4129_s13, %s4130_s18  ;;  %p4137_p9 = scmp.lt.s32.totalorder %s4135_s21, %s4130_s18 }
  0x49   : > { %p4133_p2 = pnand %p4131_p13, %p4042_p3  ;;  %p4138_p10 = por %p4137_p9, %p4136_p8 }
  0x4b   : > { %p4134_p7 = pneg %p4133_p2 }
  0x4d   : > { %p4139_p11 = pnand %p4138_p10, %p4134_p7 }
  0x4f   : > { %4142 = shalt.err (!%p4139_p11)
}
  0x50   : > { %3951 = dma.hbm_to_vmem [thread:$0]  (!%p4338_p0), %s260_s14, 64, %s262_s30, %s4346_s29  }
  0x51   : > { %270 = sbr.rel (%p4306_p6) target bundleno = 650 (0x28a), region = 40  ;;  %s272_s24 = sand.u32 (!%p4306_p6), 1, %s4224_s19  }
  0x52   : > { %s2624_s26 = sshll.u32 (!%p4306_p6), %s272_s24, 3  ;;  %s273_s9 = scalar_lea.sflag (!%p4306_p6), [#allocation4], %s272_s24 }
  0x53   : > { %s4404_s7 = scalar_lea.vmem (!%p4306_p6), [#allocation3], %s2624_s26 }
  0x56   : > { %4203 = dma.done.wait (%p4299_p5), %s273_s9, 128  }
  0x57   : > { %4205 = vsyncadd (%p4299_p5), %s273_s9, 4294967168  ;;  %s282_s15 = sand.u32 1, %s4290_s22   ;;  %s2625_s1 = sshll.u32 %s272_s24, 11 }
  0x58   : > { %s283_s29 = scalar_lea.sflag [#allocation7], %s282_s15  ;;  %s4411_s11 = scalar_lea.vmem [#allocation6], %s2625_s1 }
  0x59   : > { %4207 = dma.done.wait (%p4299_p5), %s283_s29, 32832  }
  0x5a   : > { %4209 = vsyncadd (%p4299_p5), %s283_s29, 4294934464  ;;  %s2626_s27 = sshll.u32 %s272_s24, 2 }
  0x5b   : > { %s4417_s8 = scalar_lea.vmem [#allocation8], %s2626_s27 }
  0x5c   : > { %4211 = dma.done.wait (%p44_p1), [#allocation10], 40976  }
  0x5d   : > { %4213 = vsyncadd (%p44_p1), [#allocation10], 4294926320  ;;  %342 = sbr.rel (%p2613_p4) target bundleno = 100 (0x64), region = 64 }
  0x62   : > { %v3998_v0 = vld [vmem:[#allocation11] ss:$0 sm:$0xff] }
  0x63   : > { %347 = vst [vmem:[#allocation2] sm:$0x3] %v3998_v0 }
  0x64 PF: > { %v2744_v1 = vld [vmem:[%s4411_s11 + $0xe0] sm:$0xf]  ;;  %v3691_v2 = vld [vmem:[%s4411_s11 + $0xec] sm:$0xf0]  ;;  %s3654_s23 = sshll.u32 %s4290_s22, 9  ;;  %p3655_p1 = scmp.ne.s32.totalorder %s4290_s22, 4 }
  0x65   : > { %v2872_v3 = vld [vmem:[%s4411_s11 + $0x1e0] sm:$0xf]  ;;  %v2745_v4 = vor.u32 %v3691_v2, %v2744_v1  ;;  %v3723_v5 = vld [vmem:[%s4411_s11 + $0x1ec] sm:$0xf0]  ;;  %s5002_s10 = scalar_lea.vmem [#allocation9], %s3654_s23 }
  0x66   : > { %v3000_v6 = vld [vmem:[%s4411_s11 + $0x2e0] sm:$0xf]  ;;  %v3755_v7 = vld [vmem:[%s4411_s11 + $0x2ec] sm:$0xf0]  ;;  %v2873_v8 = vor.u32 %v3723_v5, %v2872_v3 }
  0x67   : > { %v3001_v9 = vor.u32 %v3755_v7, %v3000_v6  ;;  %v3128_v10 = vld [vmem:[%s4411_s11 + $0x3e0] sm:$0xf]  ;;  %v3787_v11 = vld [vmem:[%s4411_s11 + $0x3ec] sm:$0xf0]  ;;  %1913 = vmatpush.bf16.msra.mxu0 %v2745_v4 }
  0x68   : > { %v2728_v12 = vld [vmem:[%s4411_s11 + $0xc0] sm:$0xf]  ;;  %v3129_v13 = vor.u32 %v3787_v11, %v3128_v10  ;;  %v3687_v14 = vld [vmem:[%s4411_s11 + $0xcc] sm:$0xf0]  ;;  %1926 = vmatpush.bf16.msra.mxu1 %v2873_v8 }
  0x69   : > { %v2856_v15 = vld [vmem:[%s4411_s11 + $0x1c0] sm:$0xf]  ;;  %v3719_v16 = vld [vmem:[%s4411_s11 + $0x1cc] sm:$0xf0]  ;;  %1939 = vmatpush.bf16.msra.mxu2 %v3001_v9  ;;  %v2729_v17 = vor.u32 %v3687_v14, %v2728_v12 }
  0x6a   : > { %v2857_v18 = vor.u32 %v3719_v16, %v2856_v15  ;;  %v2984_v19 = vld [vmem:[%s4411_s11 + $0x2c0] sm:$0xf]  ;;  %v3751_v20 = vld [vmem:[%s4411_s11 + $0x2cc] sm:$0xf0]  ;;  %1952 = vmatpush.bf16.msra.mxu3 %v3129_v13 }
  0x6b   : > { %v3112_v21 = vld [vmem:[%s4411_s11 + $0x3c0] sm:$0xf]  ;;  %v2985_v22 = vor.u32 %v3751_v20, %v2984_v19  ;;  %v3783_v23 = vld [vmem:[%s4411_s11 + $0x3cc] sm:$0xf0]  ;;  %1914 = vmatpush.bf16.msra.mxu0 %v2729_v17 }
  0x6c   : > { %v2712_v24 = vld [vmem:[%s4411_s11 + $0xa0] sm:$0xf]  ;;  %v3683_v25 = vld [vmem:[%s4411_s11 + $0xac] sm:$0xf0]  ;;  %v3113_v26 = vor.u32 %v3783_v23, %v3112_v21  ;;  %1927 = vmatpush.bf16.msra.mxu1 %v2857_v18 }
  0x6d   : > { %v2840_v27 = vld [vmem:[%s4411_s11 + $0x1a0] sm:$0xf]  ;;  %v3715_v28 = vld [vmem:[%s4411_s11 + $0x1ac] sm:$0xf0]  ;;  %v2713_v30 = vor.u32 %v3683_v25, %v2712_v24  ;;  %1940 = vmatpush.bf16.msra.mxu2 %v2985_v22 }
  0x6e   : > { %v2968_v29 = vld [vmem:[%s4411_s11 + $0x2a0] sm:$0xf]  ;;  %v3747_v31 = vld [vmem:[%s4411_s11 + $0x2ac] sm:$0xf0]  ;;  %v2841_v34 = vor.u32 %v3715_v28, %v2840_v27  ;;  %1953 = vmatpush.bf16.msra.mxu3 %v3113_v26 }
  0x6f   : > { %v3096_v32 = vld [vmem:[%s4411_s11 + $0x3a0] sm:$0xf]  ;;  %v3779_v33 = vld [vmem:[%s4411_s11 + $0x3ac] sm:$0xf0]  ;;  %v2969_v35 = vor.u32 %v3747_v31, %v2968_v29  ;;  %1915 = vmatpush.bf16.msra.mxu0 %v2713_v30 }
  0x70   : > { %v2696_v36 = vld [vmem:[%s4411_s11 + $0x80] sm:$0xf]  ;;  %v3679_v37 = vld [vmem:[%s4411_s11 + $0x8c] sm:$0xf0]  ;;  %v3097_v39 = vor.u32 %v3779_v33, %v3096_v32  ;;  %1928 = vmatpush.bf16.msra.mxu1 %v2841_v34 }
  0x71   : > { %v2824_v38 = vld [vmem:[%s4411_s11 + $0x180] sm:$0xf]  ;;  %v3711_v40 = vld [vmem:[%s4411_s11 + $0x18c] sm:$0xf0]  ;;  %v2697_v45 = vor.u32 %v3679_v37, %v2696_v36  ;;  %1941 = vmatpush.bf16.msra.mxu2 %v2969_v35 }
  0x72   : > { %v2952_v41 = vld [vmem:[%s4411_s11 + $0x280] sm:$0xf]  ;;  %v3743_v42 = vld [vmem:[%s4411_s11 + $0x28c] sm:$0xf0]  ;;  %v2825_v46 = vor.u32 %v3711_v40, %v2824_v38  ;;  %1954 = vmatpush.bf16.msra.mxu3 %v3097_v39 }
  0x73   : > { %v3080_v43 = vld [vmem:[%s4411_s11 + $0x380] sm:$0xf]  ;;  %v3775_v44 = vld [vmem:[%s4411_s11 + $0x38c] sm:$0xf0]  ;;  %v2953_v47 = vor.u32 %v3743_v42, %v2952_v41  ;;  %1916 = vmatpush.bf16.msra.mxu0 %v2697_v45 }
  0x74   : > { %v2680_v48 = vld [vmem:[%s4411_s11 + $0x60] sm:$0xf]  ;;  %v3675_v49 = vld [vmem:[%s4411_s11 + $0x6c] sm:$0xf0]  ;;  %v3081_v51 = vor.u32 %v3775_v44, %v3080_v43  ;;  %1929 = vmatpush.bf16.msra.mxu1 %v2825_v46 }
  0x75   : > { %v2808_v50 = vld [vmem:[%s4411_s11 + $0x160] sm:$0xf]  ;;  %v3707_v52 = vld [vmem:[%s4411_s11 + $0x16c] sm:$0xf0]  ;;  %v2681_v57 = vor.u32 %v3675_v49, %v2680_v48  ;;  %1942 = vmatpush.bf16.msra.mxu2 %v2953_v47 }
  0x76   : > { %v2936_v53 = vld [vmem:[%s4411_s11 + $0x260] sm:$0xf]  ;;  %v3739_v54 = vld [vmem:[%s4411_s11 + $0x26c] sm:$0xf0]  ;;  %v2809_v58 = vor.u32 %v3707_v52, %v2808_v50  ;;  %1955 = vmatpush.bf16.msra.mxu3 %v3081_v51 }
  0x77   : > { %v3064_v55 = vld [vmem:[%s4411_s11 + $0x360] sm:$0xf]  ;;  %v3771_v56 = vld [vmem:[%s4411_s11 + $0x36c] sm:$0xf0]  ;;  %v2937_v59 = vor.u32 %v3739_v54, %v2936_v53  ;;  %1917 = vmatpush.bf16.msra.mxu0 %v2681_v57 }
  0x78   : > { %v2664_v60 = vld [vmem:[%s4411_s11 + $0x40] sm:$0xf]  ;;  %v3671_v61 = vld [vmem:[%s4411_s11 + $0x4c] sm:$0xf0]  ;;  %v3065_v63 = vor.u32 %v3771_v56, %v3064_v55  ;;  %1930 = vmatpush.bf16.msra.mxu1 %v2809_v58 }
  0x79   : > { %v2792_v62 = vld [vmem:[%s4411_s11 + $0x140] sm:$0xf]  ;;  %v3703_v0 = vld [vmem:[%s4411_s11 + $0x14c] sm:$0xf0]  ;;  %v2665_v5 = vor.u32 %v3671_v61, %v2664_v60  ;;  %1943 = vmatpush.bf16.msra.mxu2 %v2937_v59 }
  0x7a   : > { %v2920_v1 = vld [vmem:[%s4411_s11 + $0x240] sm:$0xf]  ;;  %v3735_v2 = vld [vmem:[%s4411_s11 + $0x24c] sm:$0xf0]  ;;  %v2793_v6 = vor.u32 %v3703_v0, %v2792_v62  ;;  %1956 = vmatpush.bf16.msra.mxu3 %v3065_v63 }
  0x7b   : > { %v3048_v3 = vld [vmem:[%s4411_s11 + $0x340] sm:$0xf]  ;;  %v3767_v4 = vld [vmem:[%s4411_s11 + $0x34c] sm:$0xf0]  ;;  %v2921_v7 = vor.u32 %v3735_v2, %v2920_v1  ;;  %1918 = vmatpush.bf16.msra.mxu0 %v2665_v5 }
  0x7c   : > { %v2648_v8 = vld [vmem:[%s4411_s11 + $0x20] sm:$0xf]  ;;  %v3667_v9 = vld [vmem:[%s4411_s11 + $0x2c] sm:$0xf0]  ;;  %v3049_v11 = vor.u32 %v3767_v4, %v3048_v3  ;;  %1931 = vmatpush.bf16.msra.mxu1 %v2793_v6 }
  0x7d   : > { %v2776_v10 = vld [vmem:[%s4411_s11 + $0x120] sm:$0xf]  ;;  %v3699_v12 = vld [vmem:[%s4411_s11 + $0x12c] sm:$0xf0]  ;;  %v2649_v17 = vor.u32 %v3667_v9, %v2648_v8  ;;  %1944 = vmatpush.bf16.msra.mxu2 %v2921_v7 }
  0x7e   : > { %v2904_v13 = vld [vmem:[%s4411_s11 + $0x220] sm:$0xf]  ;;  %v3731_v14 = vld [vmem:[%s4411_s11 + $0x22c] sm:$0xf0]  ;;  %v2777_v20 = vor.u32 %v3699_v12, %v2776_v10  ;;  %1957 = vmatpush.bf16.msra.mxu3 %v3049_v11 }
  0x7f   : > { %v3032_v15 = vld [vmem:[%s4411_s11 + $0x320] sm:$0xf]  ;;  %v3763_v16 = vld [vmem:[%s4411_s11 + $0x32c] sm:$0xf0]  ;;  %v2905_v21 = vor.u32 %v3731_v14, %v2904_v13  ;;  %1919 = vmatpush.bf16.msra.mxu0 %v2649_v17 }
  0x80   : > { %v2632_v18 = vld [vmem:[%s4411_s11] sm:$0xf]  ;;  %v3663_v19 = vld [vmem:[%s4411_s11 + $0xc] sm:$0xf0]  ;;  %v3033_v25 = vor.u32 %v3763_v16, %v3032_v15  ;;  %1932 = vmatpush.bf16.msra.mxu1 %v2777_v20 }
  0x81   : > { %v2760_v22 = vld [vmem:[%s4411_s11 + $0x100] sm:$0xf]  ;;  %v3695_v23 = vld [vmem:[%s4411_s11 + $0x10c] sm:$0xf0]  ;;  %v2633_v32 = vor.u32 %v3663_v19, %v2632_v18  ;;  %1945 = vmatpush.bf16.msra.mxu2 %v2905_v21 }
  0x82   : > { %v2888_v24 = vld [vmem:[%s4411_s11 + $0x200] sm:$0xf]  ;;  %v3727_v26 = vld [vmem:[%s4411_s11 + $0x20c] sm:$0xf0]  ;;  %v2761_v36 = vor.u32 %v3695_v23, %v2760_v22  ;;  %1958 = vmatpush.bf16.msra.mxu3 %v3033_v25 }
  0x83   : > { %v3016_v27 = vld [vmem:[%s4411_s11 + $0x300] sm:$0xf]  ;;  %v3759_v28 = vld [vmem:[%s4411_s11 + $0x30c] sm:$0xf0]  ;;  %v2889_v37 = vor.u32 %v3727_v26, %v2888_v24  ;;  %1920 = vmatpush.bf16.msra.mxu0 %v2633_v32 }
  0x84   : > { %v3256_v29 = vld [vmem:[%s4411_s11 + $0x4e0] sm:$0xf]  ;;  %v3819_v30 = vld [vmem:[%s4411_s11 + $0x4ec] sm:$0xf0]  ;;  %v3017_v40 = vor.u32 %v3759_v28, %v3016_v27  ;;  %1933 = vmatpush.bf16.msra.mxu1 %v2761_v36 }
  0x85   : > { %v3384_v31 = vld [vmem:[%s4411_s11 + $0x5e0] sm:$0xf]  ;;  %v3851_v33 = vld [vmem:[%s4411_s11 + $0x5ec] sm:$0xf0]  ;;  %v3257_v41 = vor.u32 %v3819_v30, %v3256_v29  ;;  %1946 = vmatpush.bf16.msra.mxu2 %v2889_v37 }
  0x86   : > { %v3512_v34 = vld [vmem:[%s4411_s11 + $0x6e0] sm:$0xf]  ;;  %v3883_v35 = vld [vmem:[%s4411_s11 + $0x6ec] sm:$0xf0]  ;;  %v3385_v42 = vor.u32 %v3851_v33, %v3384_v31  ;;  %1959 = vmatpush.bf16.msra.mxu3 %v3017_v40 }
  0x87   : > { %v3640_v38 = vld [vmem:[%s4411_s11 + $0x7e0] sm:$0xf]  ;;  %v3915_v39 = vld [vmem:[%s4411_s11 + $0x7ec] sm:$0xf0]  ;;  %v3513_v43 = vor.u32 %v3883_v35, %v3512_v34  ;;  %1965 = vmatpush.bf16.msrb.mxu0 %v3257_v41 }
  0x88   : > { %v3240_v44 = vld [vmem:[%s4411_s11 + $0x4c0] sm:$0xf]  ;;  %v3815_v45 = vld [vmem:[%s4411_s11 + $0x4cc] sm:$0xf0]  ;;  %v3641_v47 = vor.u32 %v3915_v39, %v3640_v38  ;;  %1978 = vmatpush.bf16.msrb.mxu1 %v3385_v42 }
  0x89   : > { %v3368_v46 = vld [vmem:[%s4411_s11 + $0x5c0] sm:$0xf]  ;;  %v3847_v48 = vld [vmem:[%s4411_s11 + $0x5cc] sm:$0xf0]  ;;  %v3241_v53 = vor.u32 %v3815_v45, %v3240_v44  ;;  %1991 = vmatpush.bf16.msrb.mxu2 %v3513_v43 }
  0x8a   : > { %v3496_v49 = vld [vmem:[%s4411_s11 + $0x6c0] sm:$0xf]  ;;  %v3879_v50 = vld [vmem:[%s4411_s11 + $0x6cc] sm:$0xf0]  ;;  %v3369_v54 = vor.u32 %v3847_v48, %v3368_v46  ;;  %2004 = vmatpush.bf16.msrb.mxu3 %v3641_v47 }
  0x8b   : > { %v3624_v51 = vld [vmem:[%s4411_s11 + $0x7c0] sm:$0xf]  ;;  %v3911_v52 = vld [vmem:[%s4411_s11 + $0x7cc] sm:$0xf0]  ;;  %v3497_v55 = vor.u32 %v3879_v50, %v3496_v49  ;;  %1966 = vmatpush.bf16.msrb.mxu0 %v3241_v53 }
  0x8c   : > { %v3224_v56 = vld [vmem:[%s4411_s11 + $0x4a0] sm:$0xf]  ;;  %v3811_v57 = vld [vmem:[%s4411_s11 + $0x4ac] sm:$0xf0]  ;;  %v3625_v59 = vor.u32 %v3911_v52, %v3624_v51  ;;  %1979 = vmatpush.bf16.msrb.mxu1 %v3369_v54 }
  0x8d   : > { %v3352_v58 = vld [vmem:[%s4411_s11 + $0x5a0] sm:$0xf]  ;;  %v3843_v60 = vld [vmem:[%s4411_s11 + $0x5ac] sm:$0xf0]  ;;  %v3225_v1 = vor.u32 %v3811_v57, %v3224_v56  ;;  %1992 = vmatpush.bf16.msrb.mxu2 %v3497_v55 }
  0x8e   : > { %v3480_v61 = vld [vmem:[%s4411_s11 + $0x6a0] sm:$0xf]  ;;  %v3875_v62 = vld [vmem:[%s4411_s11 + $0x6ac] sm:$0xf0]  ;;  %v3353_v4 = vor.u32 %v3843_v60, %v3352_v58  ;;  %2005 = vmatpush.bf16.msrb.mxu3 %v3625_v59 }
  0x8f   : > { %v3608_v63 = vld [vmem:[%s4411_s11 + $0x7a0] sm:$0xf]  ;;  %v3907_v0 = vld [vmem:[%s4411_s11 + $0x7ac] sm:$0xf0]  ;;  %v3481_v5 = vor.u32 %v3875_v62, %v3480_v61  ;;  %1967 = vmatpush.bf16.msrb.mxu0 %v3225_v1 }
  0x90   : > { %v3208_v2 = vld [vmem:[%s4411_s11 + $0x480] sm:$0xf]  ;;  %v348_v3 = vld [vmem:[%s4404_s7] sm:$0xff]  ;;  %v3609_v8 = vor.u32 %v3907_v0, %v3608_v63  ;;  %1980 = vmatpush.bf16.msrb.mxu1 %v3353_v4  ;;  %v3721_v4 = vld [vmem:[%s4411_s11 + $0x1e4] sm:$0xf] }
  0x91   : > { %v3807_v6 = vld [vmem:[%s4411_s11 + $0x48c] sm:$0xf0]  ;;  %v3336_v7 = vld [vmem:[%s4411_s11 + $0x580] sm:$0xf]  ;;  %616 = vst [vmem:[#allocation1] ss:$9 sm:$0xff] %v348_v3  ;;  %1993 = vmatpush.bf16.msrb.mxu2 %v3481_v5 }
  0x92   : > { %v3839_v9 = vld [vmem:[%s4411_s11 + $0x58c] sm:$0xf0]  ;;  %v3464_v10 = vld [vmem:[%s4411_s11 + $0x680] sm:$0xf]  ;;  %v3209_v14 = vor.u32 %v3807_v6, %v3208_v2  ;;  %2006 = vmatpush.bf16.msrb.mxu3 %v3609_v8  ;;  %v3689_v2 = vld [vmem:[%s4411_s11 + $0xe4] sm:$0xf] }
  0x93   : > { %v3871_v11 = vld [vmem:[%s4411_s11 + $0x68c] sm:$0xf0]  ;;  %v3592_v12 = vld [vmem:[%s4411_s11 + $0x780] sm:$0xf]  ;;  %v3337_v15 = vor.u32 %v3839_v9, %v3336_v7  ;;  %v2746_v3 = vld [vmem:[%s4411_s11 + $0xf0] sm:$0xf0] }
  0x94   : > { %v3903_v13 = vld [vmem:[%s4411_s11 + $0x78c] sm:$0xf0]  ;;  %v3465_v16 = vor.u32 %v3871_v11, %v3464_v10  ;;  %v3192_v17 = vld [vmem:[%s4411_s11 + $0x460] sm:$0xf]  ;;  %1968 = vmatpush.bf16.msrb.mxu0 %v3209_v14  ;;  %v2874_v6 = vld [vmem:[%s4411_s11 + $0x1f0] sm:$0xf0]  ;;  %v2749_v14 = vor.u32 %v3689_v2, %v2746_v3 }
  0x95   : > { %v3803_v18 = vld [vmem:[%s4411_s11 + $0x46c] sm:$0xf0]  ;;  %v3320_v19 = vld [vmem:[%s4411_s11 + $0x560] sm:$0xf]  ;;  %v3593_v20 = vor.u32 %v3903_v13, %v3592_v12  ;;  %1981 = vmatpush.bf16.msrb.mxu1 %v3337_v15  ;;  %v3753_v7 = vld [vmem:[%s4411_s11 + $0x2e4] sm:$0xf]  ;;  %v2877_v15 = vor.u32 %v3721_v4, %v2874_v6 }
  0x96   : > { %v3835_v21 = vld [vmem:[%s4411_s11 + $0x56c] sm:$0xf0]  ;;  %v3448_v22 = vld [vmem:[%s4411_s11 + $0x660] sm:$0xf]  ;;  %v3193_v27 = vor.u32 %v3803_v18, %v3192_v17  ;;  %1994 = vmatpush.bf16.msrb.mxu2 %v3465_v16  ;;  %v3002_v8 = vld [vmem:[%s4411_s11 + $0x2f0] sm:$0xf0] }
  0x97   : > { %v3867_v23 = vld [vmem:[%s4411_s11 + $0x66c] sm:$0xf0]  ;;  %v3576_v24 = vld [vmem:[%s4411_s11 + $0x760] sm:$0xf]  ;;  %v3321_v31 = vor.u32 %v3835_v21, %v3320_v19  ;;  %2007 = vmatpush.bf16.msrb.mxu3 %v3593_v20  ;;  %v3785_v11 = vld [vmem:[%s4411_s11 + $0x3e4] sm:$0xf]  ;;  %v3005_v16 = vor.u32 %v3753_v7, %v3002_v8 }
  0x98   : > { %v3899_v25 = vld [vmem:[%s4411_s11 + $0x76c] sm:$0xf0]  ;;  %v3176_v26 = vld [vmem:[%s4411_s11 + $0x440] sm:$0xf]  ;;  %v4531_v28 = vld [vmem:[#allocation1 + $0x12] sm:$0xff]  ;;  %v3449_v32 = vor.u32 %v3867_v23, %v3448_v22  ;;  %1969 = vmatpush.bf16.msrb.mxu0 %v3193_v27 }
  0x99   : > { %v4533_v29 = vld [vmem:[#allocation1] sm:$0xff]  ;;  %v3799_v33 = vld [vmem:[%s4411_s11 + $0x44c] sm:$0xf0]  ;;  %v3304_v34 = vld [vmem:[%s4411_s11 + $0x540] sm:$0xf]  ;;  %v3577_v36 = vor.u32 %v3899_v25, %v3576_v24  ;;  %1947 = vmatmul.bf16.vlgmr.msra.gmra.mxu2 %v4531_v28  ;;  %1982 = vmatpush.bf16.msrb.mxu1 %v3321_v31 }
  0x9a   : > { %v4535_v30 = vld [vmem:[#allocation1 + $0x1b] sm:$0xff]  ;;  %v4539_v35 = vld [vmem:[#allocation1 + $0x9] sm:$0xff]  ;;  %1921 = vmatmul.bf16.vlgmr.msra.gmra.mxu0 %v4533_v29  ;;  %v3177_v42 = vor.u32 %v3799_v33, %v3176_v26  ;;  %1995 = vmatpush.bf16.msrb.mxu2 %v3449_v32 }
  0x9b   : > { %v3831_v37 = vld [vmem:[%s4411_s11 + $0x54c] sm:$0xf0]  ;;  %v3432_v38 = vld [vmem:[%s4411_s11 + $0x640] sm:$0xf]  ;;  %1960 = vmatmul.bf16.vlgmr.msra.gmra.mxu3 %v4535_v30  ;;  %1934 = vmatmul.bf16.vlgmr.msra.gmra.mxu1 %v4539_v35  ;;  %v3130_v12 = vld [vmem:[%s4411_s11 + $0x3f0] sm:$0xf0] }
  0x9c   : > { %v3863_v39 = vld [vmem:[%s4411_s11 + $0x64c] sm:$0xf0]  ;;  %v3560_v40 = vld [vmem:[%s4411_s11 + $0x740] sm:$0xf]  ;;  %v3305_v43 = vor.u32 %v3831_v37, %v3304_v34  ;;  %2008 = vmatpush.bf16.msrb.mxu3 %v3577_v36  ;;  %1970 = vmatpush.bf16.msrb.mxu0 %v3177_v42  ;;  %v3685_v17 = vld [vmem:[%s4411_s11 + $0xc4] sm:$0xf]  ;;  %v3133_v20 = vor.u32 %v3785_v11, %v3130_v12 }
  0x9d   : > { %v3895_v41 = vld [vmem:[%s4411_s11 + $0x74c] sm:$0xf0]  ;;  %v3433_v44 = vor.u32 %v3863_v39, %v3432_v38  ;;  %v3160_v45 = vld [vmem:[%s4411_s11 + $0x420] sm:$0xf]  ;;  %v2730_v18 = vld [vmem:[%s4411_s11 + $0xd0] sm:$0xf0] }
  0x9e   : > { %v3795_v46 = vld [vmem:[%s4411_s11 + $0x42c] sm:$0xf0]  ;;  %v3288_v47 = vld [vmem:[%s4411_s11 + $0x520] sm:$0xf]  ;;  %v3561_v48 = vor.u32 %v3895_v41, %v3560_v40  ;;  %1983 = vmatpush.bf16.msrb.mxu1 %v3305_v43  ;;  %v3717_v19 = vld [vmem:[%s4411_s11 + $0x1c4] sm:$0xf]  ;;  %v2733_v27 = vor.u32 %v3685_v17, %v2730_v18 }
  0x9f   : > { %v3827_v49 = vld [vmem:[%s4411_s11 + $0x52c] sm:$0xf0]  ;;  %v3416_v50 = vld [vmem:[%s4411_s11 + $0x620] sm:$0xf]  ;;  %v3161_v54 = vor.u32 %v3795_v46, %v3160_v45  ;;  %1996 = vmatpush.bf16.msrb.mxu2 %v3433_v44  ;;  %v2858_v21 = vld [vmem:[%s4411_s11 + $0x1d0] sm:$0xf0] }
  0xa0   : > { %v3859_v51 = vld [vmem:[%s4411_s11 + $0x62c] sm:$0xf0]  ;;  %v3544_v52 = vld [vmem:[%s4411_s11 + $0x720] sm:$0xf]  ;;  %v3289_v57 = vor.u32 %v3827_v49, %v3288_v47  ;;  %2009 = vmatpush.bf16.msrb.mxu3 %v3561_v48  ;;  %v3749_v22 = vld [vmem:[%s4411_s11 + $0x2c4] sm:$0xf]  ;;  %v2861_v34 = vor.u32 %v3717_v19, %v2858_v21 }
  0xa1   : > { %v3891_v53 = vld [vmem:[%s4411_s11 + $0x72c] sm:$0xf0]  ;;  %v3144_v55 = vld [vmem:[%s4411_s11 + $0x400] sm:$0xf]  ;;  %v3417_v58 = vor.u32 %v3859_v51, %v3416_v50  ;;  %1971 = vmatpush.bf16.msrb.mxu0 %v3161_v54  ;;  %v2986_v23 = vld [vmem:[%s4411_s11 + $0x2d0] sm:$0xf0] }
  0xa2   : > { %v3791_v56 = vld [vmem:[%s4411_s11 + $0x40c] sm:$0xf0]  ;;  %v3272_v59 = vld [vmem:[%s4411_s11 + $0x500] sm:$0xf]  ;;  %v3545_v62 = vor.u32 %v3891_v53, %v3544_v52  ;;  %1984 = vmatpush.bf16.msrb.mxu1 %v3289_v57  ;;  %v3781_v24 = vld [vmem:[%s4411_s11 + $0x3c4] sm:$0xf]  ;;  %v2989_v36 = vor.u32 %v3749_v22, %v2986_v23 }
  0xa3   : > { %v3823_v60 = vld [vmem:[%s4411_s11 + $0x50c] sm:$0xf0]  ;;  %v3400_v61 = vld [vmem:[%s4411_s11 + $0x600] sm:$0xf]  ;;  %v3145_v5 = vor.u32 %v3791_v56, %v3144_v55  ;;  %1997 = vmatpush.bf16.msrb.mxu2 %v3417_v58  ;;  %v3114_v25 = vld [vmem:[%s4411_s11 + $0x3d0] sm:$0xf0] }
  0xa4   : > { %v3855_v63 = vld [vmem:[%s4411_s11 + $0x60c] sm:$0xf0]  ;;  %v3528_v0 = vld [vmem:[%s4411_s11 + $0x700] sm:$0xf]  ;;  %v3273_v9 = vor.u32 %v3823_v60, %v3272_v59  ;;  %2010 = vmatpush.bf16.msrb.mxu3 %v3545_v62  ;;  %v3681_v31 = vld [vmem:[%s4411_s11 + $0xa4] sm:$0xf]  ;;  %v3117_v40 = vor.u32 %v3781_v24, %v3114_v25 }
  0xa5   : > { %v3887_v1 = vld [vmem:[%s4411_s11 + $0x70c] sm:$0xf0]  ;;  %v3401_v10 = vor.u32 %v3855_v63, %v3400_v61  ;;  %1972 = vmatpush.bf16.msrb.mxu0 %v3145_v5  ;;  %v4582_v26 = vld [vmem:[#allocation1 + $0x36] sm:$0xff]  ;;  %v4587_v33 = vld [vmem:[#allocation1 + $0x3f] sm:$0xff] }
  0xa6   : > { %v3529_v13 = vor.u32 %v3887_v1, %v3528_v0  ;;  %1985 = vmatpush.bf16.msrb.mxu1 %v3273_v9  ;;  %v4585_v32 = vld [vmem:[#allocation1 + $0x24] sm:$0xff]  ;;  %v2714_v37 = vld [vmem:[%s4411_s11 + $0xb0] sm:$0xf0]  ;;  %v3713_v38 = vld [vmem:[%s4411_s11 + $0x1a4] sm:$0xf] }
  0xa7   : > { %1998 = vmatpush.bf16.msrb.mxu2 %v3401_v10  ;;  %v4591_v39 = vld [vmem:[#allocation1 + $0x2d] sm:$0xff]  ;;  %v3745_v42 = vld [vmem:[%s4411_s11 + $0x2a4] sm:$0xf]  ;;  %v2717_v46 = vor.u32 %v3681_v31, %v2714_v37 }
  0xa8   : > { %2011 = vmatpush.bf16.msrb.mxu3 %v3529_v13  ;;  %v2842_v41 = vld [vmem:[%s4411_s11 + $0x1b0] sm:$0xf0]  ;;  %v3777_v44 = vld [vmem:[%s4411_s11 + $0x3a4] sm:$0xf] }
  0xa9   : > { %2017 = vmatpush.bf16.msra.mxu0 %v2749_v14  ;;  %v2970_v43 = vld [vmem:[%s4411_s11 + $0x2b0] sm:$0xf0]  ;;  %v2845_v47 = vor.u32 %v3713_v38, %v2842_v41  ;;  %v3677_v49 = vld [vmem:[%s4411_s11 + $0x84] sm:$0xf] }
  0xaa   : > { %2030 = vmatpush.bf16.msra.mxu1 %v2877_v15  ;;  %1999 = vmatmul.bf16.vlgmr.msrb.gmra.mxu2 %v4582_v26  ;;  %v3098_v45 = vld [vmem:[%s4411_s11 + $0x3b0] sm:$0xf0]  ;;  %v2973_v48 = vor.u32 %v3745_v42, %v2970_v43  ;;  %v3709_v51 = vld [vmem:[%s4411_s11 + $0x184] sm:$0xf] }
  0xab   : > { %2043 = vmatpush.bf16.msra.mxu2 %v3005_v16  ;;  %1973 = vmatmul.bf16.vlgmr.msrb.gmra.mxu0 %v4585_v32  ;;  %v2698_v50 = vld [vmem:[%s4411_s11 + $0x90] sm:$0xf0]  ;;  %v3101_v52 = vor.u32 %v3777_v44, %v3098_v45  ;;  %v3741_v54 = vld [vmem:[%s4411_s11 + $0x284] sm:$0xf] }
  0xac   : > { %2056 = vmatpush.bf16.msra.mxu3 %v3133_v20  ;;  %1986 = vmatmul.bf16.vlgmr.msrb.gmra.mxu1 %v4591_v39  ;;  %v2826_v53 = vld [vmem:[%s4411_s11 + $0x190] sm:$0xf0]  ;;  %v3773_v56 = vld [vmem:[%s4411_s11 + $0x384] sm:$0xf]  ;;  %v2701_v58 = vor.u32 %v3677_v49, %v2698_v50 }
  0xad   : > { %2012 = vmatmul.bf16.vlgmr.msrb.gmra.mxu3 %v4587_v33  ;;  %2018 = vmatpush.bf16.msra.mxu0 %v2733_v27  ;;  %v2954_v55 = vld [vmem:[%s4411_s11 + $0x290] sm:$0xf0]  ;;  %v2829_v59 = vor.u32 %v3709_v51, %v2826_v53  ;;  %v3673_v61 = vld [vmem:[%s4411_s11 + $0x64] sm:$0xf] }
  0xae   : > { %2031 = vmatpush.bf16.msra.mxu1 %v2861_v34  ;;  %v3082_v57 = vld [vmem:[%s4411_s11 + $0x390] sm:$0xf0]  ;;  %v2957_v60 = vor.u32 %v3741_v54, %v2954_v55  ;;  %v3705_v63 = vld [vmem:[%s4411_s11 + $0x164] sm:$0xf] }
  0xaf   : > { %2044 = vmatpush.bf16.msra.mxu2 %v2989_v36  ;;  %v2682_v62 = vld [vmem:[%s4411_s11 + $0x70] sm:$0xf0]  ;;  %v3085_v0 = vor.u32 %v3773_v56, %v3082_v57  ;;  %v3737_v2 = vld [vmem:[%s4411_s11 + $0x264] sm:$0xf] }
  0xb0   : > { %2057 = vmatpush.bf16.msra.mxu3 %v3117_v40  ;;  %v2810_v1 = vld [vmem:[%s4411_s11 + $0x170] sm:$0xf0]  ;;  %v3769_v4 = vld [vmem:[%s4411_s11 + $0x364] sm:$0xf]  ;;  %v2685_v6 = vor.u32 %v3673_v61, %v2682_v62 }
  0xb1   : > { %2019 = vmatpush.bf16.msra.mxu0 %v2717_v46  ;;  %v2938_v3 = vld [vmem:[%s4411_s11 + $0x270] sm:$0xf0]  ;;  %v2813_v7 = vor.u32 %v3705_v63, %v2810_v1  ;;  %v3669_v9 = vld [vmem:[%s4411_s11 + $0x44] sm:$0xf] }
  0xb2   : > { %2032 = vmatpush.bf16.msra.mxu1 %v2845_v47  ;;  %v3066_v5 = vld [vmem:[%s4411_s11 + $0x370] sm:$0xf0]  ;;  %v2941_v8 = vor.u32 %v3737_v2, %v2938_v3  ;;  %v3701_v11 = vld [vmem:[%s4411_s11 + $0x144] sm:$0xf] }
  0xb3   : > { %2045 = vmatpush.bf16.msra.mxu2 %v2973_v48  ;;  %v2666_v10 = vld [vmem:[%s4411_s11 + $0x50] sm:$0xf0]  ;;  %v3069_v12 = vor.u32 %v3769_v4, %v3066_v5  ;;  %v3733_v14 = vld [vmem:[%s4411_s11 + $0x244] sm:$0xf] }
  0xb4   : > { %2058 = vmatpush.bf16.msra.mxu3 %v3101_v52  ;;  %v2794_v13 = vld [vmem:[%s4411_s11 + $0x150] sm:$0xf0]  ;;  %v3765_v16 = vld [vmem:[%s4411_s11 + $0x344] sm:$0xf]  ;;  %v2669_v18 = vor.u32 %v3669_v9, %v2666_v10 }
  0xb5   : > { %2020 = vmatpush.bf16.msra.mxu0 %v2701_v58  ;;  %v2922_v15 = vld [vmem:[%s4411_s11 + $0x250] sm:$0xf0]  ;;  %v2797_v19 = vor.u32 %v3701_v11, %v2794_v13  ;;  %v3665_v21 = vld [vmem:[%s4411_s11 + $0x24] sm:$0xf] }
  0xb6   : > { %2033 = vmatpush.bf16.msra.mxu1 %v2829_v59  ;;  %v3050_v17 = vld [vmem:[%s4411_s11 + $0x350] sm:$0xf0]  ;;  %v2925_v20 = vor.u32 %v3733_v14, %v2922_v15  ;;  %v3697_v23 = vld [vmem:[%s4411_s11 + $0x124] sm:$0xf] }
  0xb7   : > { %2046 = vmatpush.bf16.msra.mxu2 %v2957_v60  ;;  %v2650_v22 = vld [vmem:[%s4411_s11 + $0x30] sm:$0xf0]  ;;  %v3053_v24 = vor.u32 %v3765_v16, %v3050_v17  ;;  %v3729_v27 = vld [vmem:[%s4411_s11 + $0x224] sm:$0xf] }
  0xb8   : > { %2059 = vmatpush.bf16.msra.mxu3 %v3085_v0  ;;  %v2778_v25 = vld [vmem:[%s4411_s11 + $0x130] sm:$0xf0]  ;;  %v3761_v34 = vld [vmem:[%s4411_s11 + $0x324] sm:$0xf]  ;;  %v2653_v37 = vor.u32 %v3665_v21, %v2650_v22 }
  0xb9   : > { %2021 = vmatpush.bf16.msra.mxu0 %v2685_v6  ;;  %v2906_v31 = vld [vmem:[%s4411_s11 + $0x230] sm:$0xf0]  ;;  %v3661_v38 = vld [vmem:[%s4411_s11 + $0x4] sm:$0xf]  ;;  %v2781_v41 = vor.u32 %v3697_v23, %v2778_v25 }
  0xba   : > { %2034 = vmatpush.bf16.msra.mxu1 %v2813_v7  ;;  %v3034_v36 = vld [vmem:[%s4411_s11 + $0x330] sm:$0xf0]  ;;  %v2909_v42 = vor.u32 %v3729_v27, %v2906_v31  ;;  %v3693_v43 = vld [vmem:[%s4411_s11 + $0x104] sm:$0xf] }
  0xbb   : > { %2047 = vmatpush.bf16.msra.mxu2 %v2941_v8  ;;  %v2634_v40 = vld [vmem:[%s4411_s11 + $0x10] sm:$0xf0]  ;;  %v3725_v45 = vld [vmem:[%s4411_s11 + $0x204] sm:$0xf]  ;;  %v3037_v46 = vor.u32 %v3761_v34, %v3034_v36 }
  0xbc   : > { %2060 = vmatpush.bf16.msra.mxu3 %v3069_v12  ;;  %v2762_v44 = vld [vmem:[%s4411_s11 + $0x110] sm:$0xf0]  ;;  %v3757_v48 = vld [vmem:[%s4411_s11 + $0x304] sm:$0xf]  ;;  %v2637_v53 = vor.u32 %v3661_v38, %v2634_v40 }
  0xbd   : > { %2022 = vmatpush.bf16.msra.mxu0 %v2669_v18  ;;  %v2890_v47 = vld [vmem:[%s4411_s11 + $0x210] sm:$0xf0]  ;;  %v3817_v50 = vld [vmem:[%s4411_s11 + $0x4e4] sm:$0xf]  ;;  %v2765_v57 = vor.u32 %v3693_v43, %v2762_v44 }
  0xbe   : > { %2035 = vmatpush.bf16.msra.mxu1 %v2797_v19  ;;  %v3018_v49 = vld [vmem:[%s4411_s11 + $0x310] sm:$0xf0]  ;;  %v3849_v52 = vld [vmem:[%s4411_s11 + $0x5e4] sm:$0xf]  ;;  %v2893_v58 = vor.u32 %v3725_v45, %v2890_v47 }
  0xbf   : > { %2048 = vmatpush.bf16.msra.mxu2 %v2925_v20  ;;  %v3258_v51 = vld [vmem:[%s4411_s11 + $0x4f0] sm:$0xf0]  ;;  %v3881_v55 = vld [vmem:[%s4411_s11 + $0x6e4] sm:$0xf]  ;;  %v3021_v61 = vor.u32 %v3757_v48, %v3018_v49 }
  0xc0   : > { %2061 = vmatpush.bf16.msra.mxu3 %v3053_v24  ;;  %v3386_v54 = vld [vmem:[%s4411_s11 + $0x5f0] sm:$0xf0]  ;;  %v3913_v59 = vld [vmem:[%s4411_s11 + $0x7e4] sm:$0xf]  ;;  %v3261_v62 = vor.u32 %v3817_v50, %v3258_v51 }
  0xc1   : > { %2023 = vmatpush.bf16.msra.mxu0 %v2653_v37  ;;  %v3514_v56 = vld [vmem:[%s4411_s11 + $0x6f0] sm:$0xf0]  ;;  %v3389_v63 = vor.u32 %v3849_v52, %v3386_v54  ;;  %v3813_v1 = vld [vmem:[%s4411_s11 + $0x4c4] sm:$0xf] }
  0xc2   : > { %2036 = vmatpush.bf16.msra.mxu1 %v2781_v41  ;;  %v3642_v60 = vld [vmem:[%s4411_s11 + $0x7f0] sm:$0xf0]  ;;  %v3517_v0 = vor.u32 %v3881_v55, %v3514_v56  ;;  %v3845_v3 = vld [vmem:[%s4411_s11 + $0x5c4] sm:$0xf] }
  0xc3   : > { %2049 = vmatpush.bf16.msra.mxu2 %v2909_v42  ;;  %v3242_v2 = vld [vmem:[%s4411_s11 + $0x4d0] sm:$0xf0]  ;;  %v3645_v4 = vor.u32 %v3913_v59, %v3642_v60  ;;  %v3877_v6 = vld [vmem:[%s4411_s11 + $0x6c4] sm:$0xf] }
  0xc4   : > { %2062 = vmatpush.bf16.msra.mxu3 %v3037_v46  ;;  %v3370_v5 = vld [vmem:[%s4411_s11 + $0x5d0] sm:$0xf0]  ;;  %v3909_v8 = vld [vmem:[%s4411_s11 + $0x7c4] sm:$0xf]  ;;  %v3245_v10 = vor.u32 %v3813_v1, %v3242_v2 }
  0xc5   : > { %2024 = vmatpush.bf16.msra.mxu0 %v2637_v53  ;;  %v3498_v7 = vld [vmem:[%s4411_s11 + $0x6d0] sm:$0xf0]  ;;  %v3373_v11 = vor.u32 %v3845_v3, %v3370_v5  ;;  %v3809_v13 = vld [vmem:[%s4411_s11 + $0x4a4] sm:$0xf] }
  0xc6   : > { %2037 = vmatpush.bf16.msra.mxu1 %v2765_v57  ;;  %v3626_v9 = vld [vmem:[%s4411_s11 + $0x7d0] sm:$0xf0]  ;;  %v3501_v12 = vor.u32 %v3877_v6, %v3498_v7  ;;  %v3841_v15 = vld [vmem:[%s4411_s11 + $0x5a4] sm:$0xf] }
  0xc7   : > { %2050 = vmatpush.bf16.msra.mxu2 %v2893_v58  ;;  %v3226_v14 = vld [vmem:[%s4411_s11 + $0x4b0] sm:$0xf0]  ;;  %v3629_v16 = vor.u32 %v3909_v8, %v3626_v9  ;;  %v3873_v18 = vld [vmem:[%s4411_s11 + $0x6a4] sm:$0xf] }
  0xc8   : > { %2063 = vmatpush.bf16.msra.mxu3 %v3021_v61  ;;  %v3354_v17 = vld [vmem:[%s4411_s11 + $0x5b0] sm:$0xf0]  ;;  %v3905_v20 = vld [vmem:[%s4411_s11 + $0x7a4] sm:$0xf]  ;;  %2025 = vmatmul.bf16.vlgmr.msra.gmra.mxu0 %v4533_v29  ;;  %v3229_v22 = vor.u32 %v3809_v13, %v3226_v14 }
  0xc9   : > { %2069 = vmatpush.bf16.msrb.mxu0 %v3261_v62  ;;  %v3482_v19 = vld [vmem:[%s4411_s11 + $0x6b0] sm:$0xf0]  ;;  %2038 = vmatmul.bf16.vlgmr.msra.gmra.mxu1 %v4539_v35  ;;  %v3357_v23 = vor.u32 %v3841_v15, %v3354_v17  ;;  %v3805_v25 = vld [vmem:[%s4411_s11 + $0x484] sm:$0xf] }
  0xca   : > { %2082 = vmatpush.bf16.msrb.mxu1 %v3389_v63  ;;  %2051 = vmatmul.bf16.vlgmr.msra.gmra.mxu2 %v4531_v28  ;;  %v3610_v21 = vld [vmem:[%s4411_s11 + $0x7b0] sm:$0xf0]  ;;  %v3485_v24 = vor.u32 %v3873_v18, %v3482_v19  ;;  %v3837_v31 = vld [vmem:[%s4411_s11 + $0x584] sm:$0xf] }
  0xcb   : > { %2095 = vmatpush.bf16.msrb.mxu2 %v3517_v0  ;;  %2064 = vmatmul.bf16.vlgmr.msra.gmra.mxu3 %v4535_v30  ;;  %v3210_v27 = vld [vmem:[%s4411_s11 + $0x490] sm:$0xf0]  ;;  %v3613_v34 = vor.u32 %v3905_v20, %v3610_v21  ;;  %v3869_v37 = vld [vmem:[%s4411_s11 + $0x684] sm:$0xf] }
  0xcc   : > { %2108 = vmatpush.bf16.msrb.mxu3 %v3645_v4  ;;  %v3338_v36 = vld [vmem:[%s4411_s11 + $0x590] sm:$0xf0]  ;;  %v3901_v40 = vld [vmem:[%s4411_s11 + $0x784] sm:$0xf]  ;;  %v3213_v42 = vor.u32 %v3805_v25, %v3210_v27  ;;  %v2752_v27 = vld [vmem:[%s4411_s11 + $0xe8] sm:$0xf] }
  0xcd   : > { %2070 = vmatpush.bf16.msrb.mxu0 %v3245_v10  ;;  %v3466_v38 = vld [vmem:[%s4411_s11 + $0x690] sm:$0xf0]  ;;  %v3341_v43 = vor.u32 %v3837_v31, %v3338_v36  ;;  %v3801_v45 = vld [vmem:[%s4411_s11 + $0x464] sm:$0xf]  ;;  %v3692_v31 = vld [vmem:[%s4411_s11 + $0xf4] sm:$0xf0] }
  0xce   : > { %2083 = vmatpush.bf16.msrb.mxu1 %v3373_v11  ;;  %v3594_v41 = vld [vmem:[%s4411_s11 + $0x790] sm:$0xf0]  ;;  %v3469_v44 = vor.u32 %v3869_v37, %v3466_v38  ;;  %v3833_v47 = vld [vmem:[%s4411_s11 + $0x564] sm:$0xf]  ;;  %v3724_v37 = vld [vmem:[%s4411_s11 + $0x1f4] sm:$0xf0] }
  0xcf   : > { %2096 = vmatpush.bf16.msrb.mxu2 %v3501_v12  ;;  %v3194_v46 = vld [vmem:[%s4411_s11 + $0x470] sm:$0xf0]  ;;  %v3597_v48 = vor.u32 %v3901_v40, %v3594_v41  ;;  %v3865_v50 = vld [vmem:[%s4411_s11 + $0x664] sm:$0xf]  ;;  %v3008_v38 = vld [vmem:[%s4411_s11 + $0x2e8] sm:$0xf] }
  0xd0   : > { %2109 = vmatpush.bf16.msrb.mxu3 %v3629_v16  ;;  %v3322_v49 = vld [vmem:[%s4411_s11 + $0x570] sm:$0xf0]  ;;  %v3897_v52 = vld [vmem:[%s4411_s11 + $0x764] sm:$0xf]  ;;  %v3197_v54 = vor.u32 %v3801_v45, %v3194_v46  ;;  %v3756_v40 = vld [vmem:[%s4411_s11 + $0x2f4] sm:$0xf0]  ;;  %v2753_v46 = vor.u32 %v3692_v31, %v2752_v27 }
  0xd1   : > { %2071 = vmatpush.bf16.msrb.mxu0 %v3229_v22  ;;  %v3450_v51 = vld [vmem:[%s4411_s11 + $0x670] sm:$0xf0]  ;;  %v3325_v55 = vor.u32 %v3833_v47, %v3322_v49  ;;  %v3797_v57 = vld [vmem:[%s4411_s11 + $0x444] sm:$0xf]  ;;  %v2736_v49 = vld [vmem:[%s4411_s11 + $0xc8] sm:$0xf] }
  0xd2   : > { %2084 = vmatpush.bf16.msrb.mxu1 %v3357_v23  ;;  %v3578_v53 = vld [vmem:[%s4411_s11 + $0x770] sm:$0xf0]  ;;  %v3453_v56 = vor.u32 %v3865_v50, %v3450_v51  ;;  %v3829_v59 = vld [vmem:[%s4411_s11 + $0x544] sm:$0xf]  ;;  %v3688_v50 = vld [vmem:[%s4411_s11 + $0xd4] sm:$0xf0] }
  0xd3   : > { %2097 = vmatpush.bf16.msrb.mxu2 %v3485_v24  ;;  %v3178_v58 = vld [vmem:[%s4411_s11 + $0x450] sm:$0xf0]  ;;  %v3581_v60 = vor.u32 %v3897_v52, %v3578_v53  ;;  %v3861_v62 = vld [vmem:[%s4411_s11 + $0x644] sm:$0xf]  ;;  %v2864_v51 = vld [vmem:[%s4411_s11 + $0x1c8] sm:$0xf] }
  0xd4   : > { %2110 = vmatpush.bf16.msrb.mxu3 %v3613_v34  ;;  %v3306_v61 = vld [vmem:[%s4411_s11 + $0x550] sm:$0xf0]  ;;  %v3893_v0 = vld [vmem:[%s4411_s11 + $0x744] sm:$0xf]  ;;  %v3181_v2 = vor.u32 %v3797_v57, %v3178_v58  ;;  %v2880_v34 = vld [vmem:[%s4411_s11 + $0x1e8] sm:$0xf]  ;;  %v2737_v58 = vor.u32 %v3688_v50, %v2736_v49 }
  0xd5   : > { %2072 = vmatpush.bf16.msrb.mxu0 %v3213_v42  ;;  %v3434_v63 = vld [vmem:[%s4411_s11 + $0x650] sm:$0xf0]  ;;  %v3309_v3 = vor.u32 %v3829_v59, %v3306_v61  ;;  %v3793_v5 = vld [vmem:[%s4411_s11 + $0x424] sm:$0xf]  ;;  %v2881_v47 = vor.u32 %v3724_v37, %v2880_v34  ;;  %v3720_v53 = vld [vmem:[%s4411_s11 + $0x1d4] sm:$0xf0] }
  0xd6   : > { %2085 = vmatpush.bf16.msrb.mxu1 %v3341_v43  ;;  %v3562_v1 = vld [vmem:[%s4411_s11 + $0x750] sm:$0xf0]  ;;  %v3437_v4 = vor.u32 %v3861_v62, %v3434_v63  ;;  %v3825_v7 = vld [vmem:[%s4411_s11 + $0x524] sm:$0xf]  ;;  %v3136_v43 = vld [vmem:[%s4411_s11 + $0x3e8] sm:$0xf]  ;;  %v2865_v59 = vor.u32 %v3720_v53, %v2864_v51 }
  0xd7   : > { %2098 = vmatpush.bf16.msrb.mxu2 %v3469_v44  ;;  %v3162_v6 = vld [vmem:[%s4411_s11 + $0x430] sm:$0xf0]  ;;  %v3565_v8 = vor.u32 %v3893_v0, %v3562_v1  ;;  %v3857_v10 = vld [vmem:[%s4411_s11 + $0x624] sm:$0xf]  ;;  %v3788_v44 = vld [vmem:[%s4411_s11 + $0x3f4] sm:$0xf0] }
  0xd8   : > { %2111 = vmatpush.bf16.msrb.mxu3 %v3597_v48  ;;  %v3290_v9 = vld [vmem:[%s4411_s11 + $0x530] sm:$0xf0]  ;;  %v3889_v12 = vld [vmem:[%s4411_s11 + $0x724] sm:$0xf]  ;;  %v3165_v14 = vor.u32 %v3793_v5, %v3162_v6  ;;  %v3009_v48 = vor.u32 %v3756_v40, %v3008_v38  ;;  %v3137_v52 = vor.u32 %v3788_v44, %v3136_v43  ;;  %v3784_v57 = vld [vmem:[%s4411_s11 + $0x3d4] sm:$0xf0] }
  0xd9   : > { %2073 = vmatpush.bf16.msrb.mxu0 %v3197_v54  ;;  %v3418_v11 = vld [vmem:[%s4411_s11 + $0x630] sm:$0xf0]  ;;  %v3789_v15 = vld [vmem:[%s4411_s11 + $0x404] sm:$0xf]  ;;  %v3293_v17 = vor.u32 %v3825_v7, %v3290_v9  ;;  %v2992_v54 = vld [vmem:[%s4411_s11 + $0x2c8] sm:$0xf] }
  0xda   : > { %2086 = vmatpush.bf16.msrb.mxu1 %v3325_v55  ;;  %v3546_v13 = vld [vmem:[%s4411_s11 + $0x730] sm:$0xf0]  ;;  %v3421_v18 = vor.u32 %v3857_v10, %v3418_v11  ;;  %v3821_v19 = vld [vmem:[%s4411_s11 + $0x504] sm:$0xf]  ;;  %v3752_v55 = vld [vmem:[%s4411_s11 + $0x2d4] sm:$0xf0] }
  0xdb   : > { %2099 = vmatpush.bf16.msrb.mxu2 %v3453_v56  ;;  %v3146_v16 = vld [vmem:[%s4411_s11 + $0x410] sm:$0xf0]  ;;  %v3853_v21 = vld [vmem:[%s4411_s11 + $0x604] sm:$0xf]  ;;  %v3549_v22 = vor.u32 %v3889_v12, %v3546_v13  ;;  %v3120_v56 = vld [vmem:[%s4411_s11 + $0x3c8] sm:$0xf] }
  0xdc   : > { %2112 = vmatpush.bf16.msrb.mxu3 %v3581_v60  ;;  %v3274_v20 = vld [vmem:[%s4411_s11 + $0x510] sm:$0xf0]  ;;  %v3885_v24 = vld [vmem:[%s4411_s11 + $0x704] sm:$0xf]  ;;  %v3149_v36 = vor.u32 %v3789_v15, %v3146_v16  ;;  %v2993_v60 = vor.u32 %v3752_v55, %v2992_v54  ;;  %v2720_v61 = vld [vmem:[%s4411_s11 + $0xa8] sm:$0xf]  ;;  %v3121_v0 = vor.u32 %v3784_v57, %v3120_v56 }
  0xdd   : > { %2074 = vmatpush.bf16.msrb.mxu0 %v3181_v2  ;;  %v3402_v23 = vld [vmem:[%s4411_s11 + $0x610] sm:$0xf0]  ;;  %v3277_v41 = vor.u32 %v3821_v19, %v3274_v20  ;;  %v3684_v62 = vld [vmem:[%s4411_s11 + $0xb4] sm:$0xf0]  ;;  %v2848_v63 = vld [vmem:[%s4411_s11 + $0x1a8] sm:$0xf] }
  0xde   : > { %2087 = vmatpush.bf16.msrb.mxu1 %v3309_v3  ;;  %v3530_v25 = vld [vmem:[%s4411_s11 + $0x710] sm:$0xf0]  ;;  %v3405_v42 = vor.u32 %v3853_v21, %v3402_v23  ;;  %v3716_v1 = vld [vmem:[%s4411_s11 + $0x1b4] sm:$0xf0]  ;;  %v2976_v2 = vld [vmem:[%s4411_s11 + $0x2a8] sm:$0xf]  ;;  %v2721_v6 = vor.u32 %v3684_v62, %v2720_v61 }
  0xdf   : > { %2100 = vmatpush.bf16.msrb.mxu2 %v3437_v4  ;;  %v3533_v45 = vor.u32 %v3885_v24, %v3530_v25  ;;  %v3748_v3 = vld [vmem:[%s4411_s11 + $0x2b4] sm:$0xf0]  ;;  %v3104_v4 = vld [vmem:[%s4411_s11 + $0x3a8] sm:$0xf] }
  0xe0   : > { %2113 = vmatpush.bf16.msrb.mxu3 %v3565_v8  ;;  %v3780_v5 = vld [vmem:[%s4411_s11 + $0x3b4] sm:$0xf0]  ;;  %v2977_v7 = vor.u32 %v3748_v3, %v2976_v2  ;;  %v2704_v8 = vld [vmem:[%s4411_s11 + $0x88] sm:$0xf] }
  0xe1   : > { %2075 = vmatpush.bf16.msrb.mxu0 %v3165_v14  ;;  %v3680_v9 = vld [vmem:[%s4411_s11 + $0x94] sm:$0xf0]  ;;  %v2832_v10 = vld [vmem:[%s4411_s11 + $0x188] sm:$0xf] }
  0xe2   : > { %2088 = vmatpush.bf16.msrb.mxu1 %v3293_v17  ;;  %v3712_v11 = vld [vmem:[%s4411_s11 + $0x194] sm:$0xf0]  ;;  %v3088_v13 = vld [vmem:[%s4411_s11 + $0x388] sm:$0xf]  ;;  %v2705_v14 = vor.u32 %v3680_v9, %v2704_v8 }
  0xe3   : > { %2101 = vmatpush.bf16.msrb.mxu2 %v3421_v18  ;;  %v3744_v12 = vld [vmem:[%s4411_s11 + $0x294] sm:$0xf0]  ;;  %v2833_v15 = vor.u32 %v3712_v11, %v2832_v10  ;;  %v2688_v17 = vld [vmem:[%s4411_s11 + $0x68] sm:$0xf] }
  0xe4   : > { %2114 = vmatpush.bf16.msrb.mxu3 %v3549_v22  ;;  %v3676_v18 = vld [vmem:[%s4411_s11 + $0x74] sm:$0xf0]  ;;  %v2816_v19 = vld [vmem:[%s4411_s11 + $0x168] sm:$0xf] }
  0xe5   : > { %2076 = vmatpush.bf16.msrb.mxu0 %v3149_v36  ;;  %v3708_v21 = vld [vmem:[%s4411_s11 + $0x174] sm:$0xf0]  ;;  %v2944_v22 = vld [vmem:[%s4411_s11 + $0x268] sm:$0xf]  ;;  %v2689_v27 = vor.u32 %v3676_v18, %v2688_v17 }
  0xe6   : > { %2089 = vmatpush.bf16.msrb.mxu1 %v3277_v41  ;;  %v3740_v23 = vld [vmem:[%s4411_s11 + $0x274] sm:$0xf0]  ;;  %v3072_v24 = vld [vmem:[%s4411_s11 + $0x368] sm:$0xf]  ;;  %v2817_v31 = vor.u32 %v3708_v21, %v2816_v19 }
  0xe7   : > { %2102 = vmatpush.bf16.msrb.mxu2 %v3405_v42  ;;  %v3772_v25 = vld [vmem:[%s4411_s11 + $0x374] sm:$0xf0]  ;;  %v2945_v34 = vor.u32 %v3740_v23, %v2944_v22  ;;  %v2672_v36 = vld [vmem:[%s4411_s11 + $0x48] sm:$0xf] }
  0xe8   : > { %2115 = vmatpush.bf16.msrb.mxu3 %v3533_v45  ;;  %2077 = vmatmul.bf16.vlgmr.msrb.gmra.mxu0 %v4585_v32  ;;  %v3105_v32 = vor.u32 %v3780_v5, %v3104_v4  ;;  %v3672_v37 = vld [vmem:[%s4411_s11 + $0x54] sm:$0xf0]  ;;  %v2800_v38 = vld [vmem:[%s4411_s11 + $0x148] sm:$0xf]  ;;  %v3073_v40 = vor.u32 %v3772_v25, %v3072_v24 }
  0xe9   : > { %2121 = vmatpush.bf16.msra.mxu0 %v2753_v46  ;;  %2090 = vmatmul.bf16.vlgmr.msrb.gmra.mxu1 %v4591_v39  ;;  %v3776_v39 = vld [vmem:[%s4411_s11 + $0x394] sm:$0xf0]  ;;  %v2928_v42 = vld [vmem:[%s4411_s11 + $0x248] sm:$0xf]  ;;  %v2673_v46 = vor.u32 %v3672_v37, %v2672_v36 }
  0xea   : > { %2134 = vmatpush.bf16.msra.mxu1 %v2881_v47  ;;  %2103 = vmatmul.bf16.vlgmr.msrb.gmra.mxu2 %v4582_v26  ;;  %v2849_v26 = vor.u32 %v3716_v1, %v2848_v63  ;;  %v3089_v20 = vor.u32 %v3776_v39, %v3088_v13  ;;  %v3704_v41 = vld [vmem:[%s4411_s11 + $0x154] sm:$0xf0]  ;;  %v3056_v44 = vld [vmem:[%s4411_s11 + $0x348] sm:$0xf] }
  0xeb   : > { %2147 = vmatpush.bf16.msra.mxu2 %v3009_v48  ;;  %2116 = vmatmul.bf16.vlgmr.msrb.gmra.mxu3 %v4587_v33  ;;  %v2960_v33 = vld [vmem:[%s4411_s11 + $0x288] sm:$0xf]  ;;  %v3736_v43 = vld [vmem:[%s4411_s11 + $0x254] sm:$0xf0]  ;;  %v2801_v47 = vor.u32 %v3704_v41, %v2800_v38 }
  0xec   : > { %2160 = vmatpush.bf16.msra.mxu3 %v3137_v52  ;;  %v2961_v16 = vor.u32 %v3744_v12, %v2960_v33  ;;  %v3768_v45 = vld [vmem:[%s4411_s11 + $0x354] sm:$0xf0]  ;;  %v2929_v48 = vor.u32 %v3736_v43, %v2928_v42  ;;  %v2656_v49 = vld [vmem:[%s4411_s11 + $0x28] sm:$0xf] }
  0xed   : > { %2122 = vmatpush.bf16.msra.mxu0 %v2737_v58  ;;  %v3668_v50 = vld [vmem:[%s4411_s11 + $0x34] sm:$0xf0]  ;;  %v2784_v51 = vld [vmem:[%s4411_s11 + $0x128] sm:$0xf]  ;;  %v3057_v52 = vor.u32 %v3768_v45, %v3056_v44 }
  0xee   : > { %2135 = vmatpush.bf16.msra.mxu1 %v2865_v59  ;;  %v3700_v53 = vld [vmem:[%s4411_s11 + $0x134] sm:$0xf0]  ;;  %v2912_v54 = vld [vmem:[%s4411_s11 + $0x228] sm:$0xf]  ;;  %v2657_v58 = vor.u32 %v3668_v50, %v2656_v49 }
  0xef   : > { %2148 = vmatpush.bf16.msra.mxu2 %v2993_v60  ;;  %v3732_v55 = vld [vmem:[%s4411_s11 + $0x234] sm:$0xf0]  ;;  %v3040_v56 = vld [vmem:[%s4411_s11 + $0x328] sm:$0xf]  ;;  %v2785_v61 = vor.u32 %v3700_v53, %v2784_v51 }
  0xf0   : > { %2161 = vmatpush.bf16.msra.mxu3 %v3121_v0  ;;  %v3764_v57 = vld [vmem:[%s4411_s11 + $0x334] sm:$0xf0]  ;;  %v2640_v59 = vld [vmem:[%s4411_s11 + $0x8] sm:$0xf]  ;;  %v2913_v62 = vor.u32 %v3732_v55, %v2912_v54 }
  0xf1   : > { %2123 = vmatpush.bf16.msra.mxu0 %v2721_v6  ;;  %v3664_v60 = vld [vmem:[%s4411_s11 + $0x14] sm:$0xf0]  ;;  %v2768_v63 = vld [vmem:[%s4411_s11 + $0x108] sm:$0xf]  ;;  %v3041_v2 = vor.u32 %v3764_v57, %v3040_v56 }
  0xf2   : > { %2136 = vmatpush.bf16.msra.mxu1 %v2849_v26  ;;  %v3696_v0 = vld [vmem:[%s4411_s11 + $0x114] sm:$0xf0]  ;;  %v2896_v1 = vld [vmem:[%s4411_s11 + $0x208] sm:$0xf]  ;;  %v2641_v8 = vor.u32 %v3664_v60, %v2640_v59 }
  0xf3   : > { %2149 = vmatpush.bf16.msra.mxu2 %v2977_v7  ;;  %v3728_v3 = vld [vmem:[%s4411_s11 + $0x214] sm:$0xf0]  ;;  %v3024_v4 = vld [vmem:[%s4411_s11 + $0x308] sm:$0xf]  ;;  %v2769_v11 = vor.u32 %v3696_v0, %v2768_v63 }
  0xf4   : > { %2162 = vmatpush.bf16.msra.mxu3 %v3105_v32  ;;  %v3760_v5 = vld [vmem:[%s4411_s11 + $0x314] sm:$0xf0]  ;;  %v3264_v6 = vld [vmem:[%s4411_s11 + $0x4e8] sm:$0xf]  ;;  %v2897_v33 = vor.u32 %v3728_v3, %v2896_v1 }
  0xf5   : > { %2124 = vmatpush.bf16.msra.mxu0 %v2705_v14  ;;  %v3820_v26 = vld [vmem:[%s4411_s11 + $0x4f4] sm:$0xf0]  ;;  %v3392_v7 = vld [vmem:[%s4411_s11 + $0x5e8] sm:$0xf]  ;;  %v3025_v39 = vor.u32 %v3760_v5, %v3024_v4 }
  0xf6   : > { %2137 = vmatpush.bf16.msra.mxu1 %v2833_v15  ;;  %v3852_v9 = vld [vmem:[%s4411_s11 + $0x5f4] sm:$0xf0]  ;;  %v3520_v10 = vld [vmem:[%s4411_s11 + $0x6e8] sm:$0xf]  ;;  %v3265_v14 = vor.u32 %v3820_v26, %v3264_v6 }
  0xf7   : > { %2150 = vmatpush.bf16.msra.mxu2 %v2961_v16  ;;  %v3884_v32 = vld [vmem:[%s4411_s11 + $0x6f4] sm:$0xf0]  ;;  %v3648_v12 = vld [vmem:[%s4411_s11 + $0x7e8] sm:$0xf]  ;;  %v3393_v15 = vor.u32 %v3852_v9, %v3392_v7 }
  0xf8   : > { %2163 = vmatpush.bf16.msra.mxu3 %v3089_v20  ;;  %v3916_v13 = vld [vmem:[%s4411_s11 + $0x7f4] sm:$0xf0]  ;;  %v3521_v16 = vor.u32 %v3884_v32, %v3520_v10  ;;  %v3248_v17 = vld [vmem:[%s4411_s11 + $0x4c8] sm:$0xf]  ;;  %v4829_v32 = vld [vmem:[%s4417_s8] sm:$0xf] }
  0xf9   : > { %2125 = vmatpush.bf16.msra.mxu0 %v2689_v27  ;;  %v3816_v18 = vld [vmem:[%s4411_s11 + $0x4d4] sm:$0xf0]  ;;  %v3376_v19 = vld [vmem:[%s4411_s11 + $0x5c8] sm:$0xf]  ;;  %v3649_v20 = vor.u32 %v3916_v13, %v3648_v12 }
  0xfa   : > { %2138 = vmatpush.bf16.msra.mxu1 %v2817_v31  ;;  %v3848_v21 = vld [vmem:[%s4411_s11 + $0x5d4] sm:$0xf0]  ;;  %v3504_v22 = vld [vmem:[%s4411_s11 + $0x6c8] sm:$0xf]  ;;  %v3249_v27 = vor.u32 %v3816_v18, %v3248_v17  ;;  %v607_v17 = vperm.slane %v4829_v32, 0 }
  0xfb   : > { %2151 = vmatpush.bf16.msra.mxu2 %v2945_v34  ;;  %v3880_v23 = vld [vmem:[%s4411_s11 + $0x6d4] sm:$0xf0]  ;;  %v3632_v24 = vld [vmem:[%s4411_s11 + $0x7c8] sm:$0xf]  ;;  %v3377_v31 = vor.u32 %v3848_v21, %v3376_v19 }
  0xfc   : > { %2164 = vmatpush.bf16.msra.mxu3 %v3073_v40  ;;  %v3912_v25 = vld [vmem:[%s4411_s11 + $0x7d4] sm:$0xf0]  ;;  %v3505_v34 = vor.u32 %v3880_v23, %v3504_v22  ;;  %v3232_v36 = vld [vmem:[%s4411_s11 + $0x4a8] sm:$0xf] }
  0xfd   : > { %2126 = vmatpush.bf16.msra.mxu0 %v2673_v46  ;;  %v3812_v37 = vld [vmem:[%s4411_s11 + $0x4b4] sm:$0xf0]  ;;  %v3360_v38 = vld [vmem:[%s4411_s11 + $0x5a8] sm:$0xf]  ;;  %v3633_v40 = vor.u32 %v3912_v25, %v3632_v24 }
  0xfe   : > { %2139 = vmatpush.bf16.msra.mxu1 %v2801_v47  ;;  %v3844_v41 = vld [vmem:[%s4411_s11 + $0x5b4] sm:$0xf0]  ;;  %v3488_v42 = vld [vmem:[%s4411_s11 + $0x6a8] sm:$0xf]  ;;  %v3233_v46 = vor.u32 %v3812_v37, %v3232_v36 }
  0xff   : > { %2152 = vmatpush.bf16.msra.mxu2 %v2929_v48  ;;  %v3876_v43 = vld [vmem:[%s4411_s11 + $0x6b4] sm:$0xf0]  ;;  %v3616_v44 = vld [vmem:[%s4411_s11 + $0x7a8] sm:$0xf]  ;;  %v3361_v47 = vor.u32 %v3844_v41, %v3360_v38 }
 0x100   : > { %2165 = vmatpush.bf16.msra.mxu3 %v3057_v52  ;;  %v3908_v45 = vld [vmem:[%s4411_s11 + $0x7b4] sm:$0xf0]  ;;  %v3489_v48 = vor.u32 %v3876_v43, %v3488_v42  ;;  %v3344_v50 = vld [vmem:[%s4411_s11 + $0x588] sm:$0xf] }
 0x101   : > { %2127 = vmatpush.bf16.msra.mxu0 %v2657_v58  ;;  %v3808_v49 = vld [vmem:[%s4411_s11 + $0x494] sm:$0xf0]  ;;  %v3600_v53 = vld [vmem:[%s4411_s11 + $0x788] sm:$0xf] }
 0x102   : > { %2140 = vmatpush.bf16.msra.mxu1 %v2785_v61  ;;  %v3840_v51 = vld [vmem:[%s4411_s11 + $0x594] sm:$0xf0]  ;;  %v3200_v57 = vld [vmem:[%s4411_s11 + $0x468] sm:$0xf] }
 0x103   : > { %2153 = vmatpush.bf16.msra.mxu2 %v2913_v62  ;;  %v3872_v52 = vld [vmem:[%s4411_s11 + $0x694] sm:$0xf0]  ;;  %v3345_v55 = vor.u32 %v3840_v51, %v3344_v50  ;;  %v3328_v59 = vld [vmem:[%s4411_s11 + $0x568] sm:$0xf]  ;;  %v3754_v51 = vld [vmem:[%s4411_s11 + $0x2ec] sm:$0xf] }
 0x104   : > { %2166 = vmatpush.bf16.msra.mxu3 %v3041_v2  ;;  %v3804_v58 = vld [vmem:[%s4411_s11 + $0x474] sm:$0xf0]  ;;  %v3456_v62 = vld [vmem:[%s4411_s11 + $0x668] sm:$0xf] }
 0x105   : > { %2128 = vmatpush.bf16.msra.mxu0 %v2641_v8  ;;  %v3836_v61 = vld [vmem:[%s4411_s11 + $0x574] sm:$0xf0]  ;;  %v3584_v0 = vld [vmem:[%s4411_s11 + $0x768] sm:$0xf]  ;;  %v3201_v2 = vor.u32 %v3804_v58, %v3200_v57 }
 0x106   : > { %2141 = vmatpush.bf16.msra.mxu1 %v2769_v11  ;;  %v3868_v63 = vld [vmem:[%s4411_s11 + $0x674] sm:$0xf0]  ;;  %v3184_v3 = vld [vmem:[%s4411_s11 + $0x448] sm:$0xf]  ;;  %v3329_v4 = vor.u32 %v3836_v61, %v3328_v59 }
 0x107   : > { %2154 = vmatpush.bf16.msra.mxu2 %v2897_v33  ;;  %v3900_v1 = vld [vmem:[%s4411_s11 + $0x774] sm:$0xf0]  ;;  %v3457_v5 = vor.u32 %v3868_v63, %v3456_v62  ;;  %v3312_v26 = vld [vmem:[%s4411_s11 + $0x548] sm:$0xf]  ;;  %v3686_v62 = vld [vmem:[%s4411_s11 + $0xcc] sm:$0xf] }
 0x108   : > { %2167 = vmatpush.bf16.msra.mxu3 %v3025_v39  ;;  %2129 = vmatmul.bf16.vlgmr.msra.gmra.mxu0 %v4533_v29  ;;  %v3617_v29 = vor.u32 %v3908_v45, %v3616_v44  ;;  %v3800_v6 = vld [vmem:[%s4411_s11 + $0x454] sm:$0xf0]  ;;  %v3585_v8 = vor.u32 %v3900_v1, %v3584_v0  ;;  %v3440_v9 = vld [vmem:[%s4411_s11 + $0x648] sm:$0xf]  ;;  %v2738_v63 = vld [vmem:[%s4411_s11 + $0xd8] sm:$0xf0] }
 0x109   : > { %2173 = vmatpush.bf16.msrb.mxu0 %v3265_v14  ;;  %2142 = vmatmul.bf16.vlgmr.msra.gmra.mxu1 %v4539_v35  ;;  %v3904_v35 = vld [vmem:[%s4411_s11 + $0x794] sm:$0xf0]  ;;  %v3568_v11 = vld [vmem:[%s4411_s11 + $0x748] sm:$0xf]  ;;  %v3185_v12 = vor.u32 %v3800_v6, %v3184_v3  ;;  %v3718_v0 = vld [vmem:[%s4411_s11 + $0x1cc] sm:$0xf] }
 0x10a   : > { %2186 = vmatpush.bf16.msrb.mxu1 %v3393_v15  ;;  %2155 = vmatmul.bf16.vlgmr.msra.gmra.mxu2 %v4531_v28  ;;  %v3216_v28 = vld [vmem:[%s4411_s11 + $0x488] sm:$0xf]  ;;  %v3601_v60 = vor.u32 %v3904_v35, %v3600_v53  ;;  %v3832_v7 = vld [vmem:[%s4411_s11 + $0x554] sm:$0xf0]  ;;  %v3786_v35 = vld [vmem:[%s4411_s11 + $0x3ec] sm:$0xf] }
 0x10b   : > { %2199 = vmatpush.bf16.msrb.mxu2 %v3521_v16  ;;  %2168 = vmatmul.bf16.vlgmr.msra.gmra.mxu3 %v4535_v30  ;;  %v3472_v30 = vld [vmem:[%s4411_s11 + $0x688] sm:$0xf]  ;;  %v3217_v54 = vor.u32 %v3808_v49, %v3216_v28  ;;  %v3864_v10 = vld [vmem:[%s4411_s11 + $0x654] sm:$0xf0]  ;;  %v3313_v39 = vor.u32 %v3832_v7, %v3312_v26  ;;  %v3722_v28 = vld [vmem:[%s4411_s11 + $0x1ec] sm:$0xf] }
 0x10c   : > { %2212 = vmatpush.bf16.msrb.mxu3 %v3649_v20  ;;  %v3473_v56 = vor.u32 %v3872_v52, %v3472_v30  ;;  %v3896_v33 = vld [vmem:[%s4411_s11 + $0x754] sm:$0xf0]  ;;  %v3168_v13 = vld [vmem:[%s4411_s11 + $0x428] sm:$0xf]  ;;  %v3441_v14 = vor.u32 %v3864_v10, %v3440_v9  ;;  %v3010_v30 = vld [vmem:[%s4411_s11 + $0x2f8] sm:$0xf0]  ;;  %v2741_v9 = vor.u32 %v3686_v62, %v2738_v63 }
 0x10d   : > { %2174 = vmatpush.bf16.msrb.mxu0 %v3249_v27  ;;  %v3796_v15 = vld [vmem:[%s4411_s11 + $0x434] sm:$0xf0]  ;;  %v3296_v16 = vld [vmem:[%s4411_s11 + $0x528] sm:$0xf]  ;;  %v3569_v18 = vor.u32 %v3896_v33, %v3568_v11  ;;  %v3013_v61 = vor.u32 %v3754_v51, %v3010_v30  ;;  %v3750_v3 = vld [vmem:[%s4411_s11 + $0x2cc] sm:$0xf] }
 0x10e   : > { %2187 = vmatpush.bf16.msrb.mxu1 %v3377_v31  ;;  %v3828_v19 = vld [vmem:[%s4411_s11 + $0x534] sm:$0xf0]  ;;  %v3424_v20 = vld [vmem:[%s4411_s11 + $0x628] sm:$0xf]  ;;  %v3169_v24 = vor.u32 %v3796_v15, %v3168_v13  ;;  %v3782_v26 = vld [vmem:[%s4411_s11 + $0x3cc] sm:$0xf] }
 0x10f   : > { %2200 = vmatpush.bf16.msrb.mxu2 %v3505_v34  ;;  %v3860_v21 = vld [vmem:[%s4411_s11 + $0x634] sm:$0xf0]  ;;  %v3552_v22 = vld [vmem:[%s4411_s11 + $0x728] sm:$0xf]  ;;  %v3297_v34 = vor.u32 %v3828_v19, %v3296_v16  ;;  %v3122_v7 = vld [vmem:[%s4411_s11 + $0x3d8] sm:$0xf0] }
 0x110   : > { %2213 = vmatpush.bf16.msrb.mxu3 %v3633_v40  ;;  %v3892_v23 = vld [vmem:[%s4411_s11 + $0x734] sm:$0xf0]  ;;  %v3152_v25 = vld [vmem:[%s4411_s11 + $0x408] sm:$0xf]  ;;  %v3425_v36 = vor.u32 %v3860_v21, %v3424_v20  ;;  %v3682_v33 = vld [vmem:[%s4411_s11 + $0xac] sm:$0xf] }
 0x111   : > { %2175 = vmatpush.bf16.msrb.mxu0 %v3233_v46  ;;  %v3792_v27 = vld [vmem:[%s4411_s11 + $0x414] sm:$0xf0]  ;;  %v3280_v37 = vld [vmem:[%s4411_s11 + $0x508] sm:$0xf]  ;;  %v3553_v43 = vor.u32 %v3892_v23, %v3552_v22  ;;  %v3714_v13 = vld [vmem:[%s4411_s11 + $0x1ac] sm:$0xf] }
 0x112   : > { %2188 = vmatpush.bf16.msrb.mxu1 %v3361_v47  ;;  %v3824_v38 = vld [vmem:[%s4411_s11 + $0x514] sm:$0xf0]  ;;  %v3408_v40 = vld [vmem:[%s4411_s11 + $0x608] sm:$0xf]  ;;  %v3690_v47 = vld [vmem:[%s4411_s11 + $0xec] sm:$0xf]  ;;  %v3153_v50 = vor.u32 %v3792_v27, %v3152_v25 }
 0x113   : > { %2201 = vmatpush.bf16.msrb.mxu2 %v3489_v48  ;;  %v3856_v44 = vld [vmem:[%s4411_s11 + $0x614] sm:$0xf0]  ;;  %v3536_v45 = vld [vmem:[%s4411_s11 + $0x708] sm:$0xf]  ;;  %v2754_v48 = vld [vmem:[%s4411_s11 + $0xf8] sm:$0xf0]  ;;  %v3281_v52 = vor.u32 %v3824_v38, %v3280_v37 }
 0x114   : > { %2214 = vmatpush.bf16.msrb.mxu3 %v3617_v29  ;;  %v3888_v46 = vld [vmem:[%s4411_s11 + $0x714] sm:$0xf0]  ;;  %v2882_v29 = vld [vmem:[%s4411_s11 + $0x1f8] sm:$0xf0]  ;;  %v3409_v53 = vor.u32 %v3856_v44, %v3408_v40  ;;  %v2757_v57 = vor.u32 %v3690_v47, %v2754_v48  ;;  %v3746_v16 = vld [vmem:[%s4411_s11 + $0x2ac] sm:$0xf] }
 0x115   : > { %2176 = vmatpush.bf16.msrb.mxu0 %v3217_v54  ;;  %v3138_v54 = vld [vmem:[%s4411_s11 + $0x3f8] sm:$0xf0]  ;;  %v4878_v19 = vld [vmem:[#allocation1 + $0x3f] sm:$0xff]  ;;  %v4883_v23 = vld [vmem:[#allocation1 + $0x2d] sm:$0xff] }
 0x116   : > { %2189 = vmatpush.bf16.msrb.mxu1 %v3345_v55  ;;  %v3141_v1 = vor.u32 %v3786_v35, %v3138_v54  ;;  %v2850_v15 = vld [vmem:[%s4411_s11 + $0x1b8] sm:$0xf0]  ;;  %v3778_v20 = vld [vmem:[%s4411_s11 + $0x3ac] sm:$0xf] }
 0x117   : > { %2202 = vmatpush.bf16.msrb.mxu2 %v3473_v56  ;;  %v1922_v31 = vpop.f32.mrf.mxu0  ;;  %v3537_v56 = vor.u32 %v3888_v46, %v3536_v45  ;;  %v3106_v21 = vld [vmem:[%s4411_s11 + $0x3b8] sm:$0xf0]  ;;  %v2853_v27 = vor.u32 %v3714_v13, %v2850_v15  ;;  %v3710_v37 = vld [vmem:[%s4411_s11 + $0x18c] sm:$0xf] }
 0x118   : > { %2215 = vmatpush.bf16.msrb.mxu3 %v3601_v60  ;;  %v1923_v41 = vadd.f32 %v1922_v31, %v607_v17  ;;  %v1935_v42 = vpop.f32.mrf.mxu1  ;;  %v2885_v60 = vor.u32 %v3722_v28, %v2882_v29  ;;  %v2978_v17 = vld [vmem:[%s4411_s11 + $0x2b8] sm:$0xf0]  ;;  %v3109_v38 = vor.u32 %v3778_v20, %v3106_v21  ;;  %v3674_v28 = vld [vmem:[%s4411_s11 + $0x6c] sm:$0xf] }
 0x119   : > { %2177 = vmatpush.bf16.msrb.mxu0 %v3201_v2  ;;  %v2866_v2 = vld [vmem:[%s4411_s11 + $0x1d8] sm:$0xf0]  ;;  %v2981_v31 = vor.u32 %v3746_v16, %v2978_v17  ;;  %v3770_v54 = vld [vmem:[%s4411_s11 + $0x36c] sm:$0xf] }
 0x11a   : > { %2190 = vmatpush.bf16.msrb.mxu1 %v3329_v4  ;;  %v1936_v49 = vadd.f32 %v1935_v42, %v1923_v41  ;;  %v2994_v4 = vld [vmem:[%s4411_s11 + $0x2d8] sm:$0xf0]  ;;  %v2869_v10 = vor.u32 %v3718_v0, %v2866_v2  ;;  %v3742_v41 = vld [vmem:[%s4411_s11 + $0x28c] sm:$0xf] }
 0x11b   : > { %2203 = vmatpush.bf16.msrb.mxu2 %v3457_v5  ;;  %v2997_v11 = vor.u32 %v3750_v3, %v2994_v4  ;;  %v2834_v40 = vld [vmem:[%s4411_s11 + $0x198] sm:$0xf0]  ;;  %v3702_v62 = vld [vmem:[%s4411_s11 + $0x14c] sm:$0xf] }
 0x11c   : > { %2216 = vmatpush.bf16.msrb.mxu3 %v3585_v8  ;;  %v1948_v55 = vpop.f32.mrf.mxu2  ;;  %v2962_v42 = vld [vmem:[%s4411_s11 + $0x298] sm:$0xf0]  ;;  %v2837_v47 = vor.u32 %v3710_v37, %v2834_v40  ;;  %v3734_v2 = vld [vmem:[%s4411_s11 + $0x24c] sm:$0xf] }
 0x11d   : > { %2178 = vmatpush.bf16.msrb.mxu0 %v3185_v12  ;;  %v1949_v58 = vadd.f32 %v1948_v55, %v1936_v49  ;;  %v2722_v12 = vld [vmem:[%s4411_s11 + $0xb8] sm:$0xf0]  ;;  %v2965_v48 = vor.u32 %v3742_v41, %v2962_v42  ;;  %v3698_v13 = vld [vmem:[%s4411_s11 + $0x12c] sm:$0xf] }
 0x11e   : > { %2191 = vmatpush.bf16.msrb.mxu1 %v3313_v39  ;;  %v1961_v59 = vpop.f32.mrf.mxu3  ;;  %v4869_v39 = vld [vmem:[#allocation1 + $0x36] sm:$0xff]  ;;  %v3730_v17 = vld [vmem:[%s4411_s11 + $0x22c] sm:$0xf] }
 0x11f   : > { %2204 = vmatpush.bf16.msrb.mxu2 %v3441_v14  ;;  %v1962_v5 = vadd.f32 %v1961_v59, %v1949_v58  ;;  %v1924_v6 = vpop.f32.mrf.mxu0  ;;  %v3125_v14 = vor.u32 %v3782_v26, %v3122_v7  ;;  %v3090_v44 = vld [vmem:[%s4411_s11 + $0x398] sm:$0xf0]  ;;  %v3762_v21 = vld [vmem:[%s4411_s11 + $0x32c] sm:$0xf] }
 0x120   : > { %2217 = vmatpush.bf16.msrb.mxu3 %v3569_v18  ;;  %v1937_v8 = vpop.f32.mrf.mxu1  ;;  %v4875_v18 = vld [vmem:[#allocation1 + $0x24] sm:$0xff]  ;;  %v2690_v49 = vld [vmem:[%s4411_s11 + $0x78] sm:$0xf0] }
 0x121   : > { %2179 = vmatpush.bf16.msrb.mxu0 %v3169_v24  ;;  %v2725_v24 = vor.u32 %v3682_v33, %v2722_v12  ;;  %v2946_v35 = vld [vmem:[%s4411_s11 + $0x278] sm:$0xf0]  ;;  %v3766_v6 = vld [vmem:[%s4411_s11 + $0x34c] sm:$0xf] }
 0x122   : > { %2192 = vmatpush.bf16.msrb.mxu1 %v3297_v34  ;;  %v3678_v34 = vld [vmem:[%s4411_s11 + $0x8c] sm:$0xf]  ;;  %v3074_v55 = vld [vmem:[%s4411_s11 + $0x378] sm:$0xf0] }
 0x123   : > { %2205 = vmatpush.bf16.msrb.mxu2 %v3425_v36  ;;  %v2706_v36 = vld [vmem:[%s4411_s11 + $0x98] sm:$0xf0]  ;;  %v3077_v0 = vor.u32 %v3770_v54, %v3074_v55  ;;  %v3666_v33 = vld [vmem:[%s4411_s11 + $0x2c] sm:$0xf] }
 0x124   : > { %2218 = vmatpush.bf16.msrb.mxu3 %v3553_v43  ;;  %v1950_v22 = vpop.f32.mrf.mxu2  ;;  %v3774_v43 = vld [vmem:[%s4411_s11 + $0x38c] sm:$0xf]  ;;  %v2709_v45 = vor.u32 %v3678_v34, %v2706_v36  ;;  %v2930_v3 = vld [vmem:[%s4411_s11 + $0x258] sm:$0xf0] }
 0x125   : > { %2180 = vmatpush.bf16.msrb.mxu0 %v3153_v50  ;;  %v3706_v50 = vld [vmem:[%s4411_s11 + $0x16c] sm:$0xf]  ;;  %v3093_v30 = vor.u32 %v3774_v43, %v3090_v44  ;;  %v3058_v26 = vld [vmem:[%s4411_s11 + $0x358] sm:$0xf0] }
 0x126   : > { %2193 = vmatpush.bf16.msrb.mxu1 %v3281_v52  ;;  %v1963_v25 = vpop.f32.mrf.mxu3  ;;  %v2818_v52 = vld [vmem:[%s4411_s11 + $0x178] sm:$0xf0]  ;;  %v3061_v15 = vor.u32 %v3766_v6, %v3058_v26  ;;  %v3694_v36 = vld [vmem:[%s4411_s11 + $0x10c] sm:$0xf] }
 0x127   : > { %2206 = vmatpush.bf16.msrb.mxu2 %v3409_v53  ;;  %v3738_v53 = vld [vmem:[%s4411_s11 + $0x26c] sm:$0xf]  ;;  %v2821_v58 = vor.u32 %v3706_v50, %v2818_v52  ;;  %v2658_v12 = vld [vmem:[%s4411_s11 + $0x38] sm:$0xf0] }
 0x128   : > { %2219 = vmatpush.bf16.msrb.mxu3 %v3537_v56  ;;  %2181 = vmatmul.bf16.vlgmr.msrb.gmra.mxu0 %v4875_v18  ;;  %v1974_v46 = vpop.f32.mrf.mxu0  ;;  %v2949_v59 = vor.u32 %v3738_v53, %v2946_v35  ;;  %v2786_v16 = vld [vmem:[%s4411_s11 + $0x138] sm:$0xf0]  ;;  %v3662_v25 = vld [vmem:[%s4411_s11 + $0xc] sm:$0xf] }
 0x129   : > { %2225 = vmatpush.bf16.msra.mxu0 %v2757_v57  ;;  %2194 = vmatmul.bf16.vlgmr.msrb.gmra.mxu1 %v4883_v23  ;;  %v1975_v29 = vadd.f32 %v1974_v46, %v1962_v5  ;;  %v1987_v51 = vpop.f32.mrf.mxu1  ;;  %v2693_v57 = vor.u32 %v3674_v28, %v2690_v49  ;;  %v2914_v20 = vld [vmem:[%s4411_s11 + $0x238] sm:$0xf0]  ;;  %v3758_v43 = vld [vmem:[%s4411_s11 + $0x30c] sm:$0xf] }
 0x12a   : > { %2238 = vmatpush.bf16.msra.mxu1 %v2885_v60  ;;  %2207 = vmatmul.bf16.vlgmr.msrb.gmra.mxu2 %v4869_v39  ;;  %v3670_v60 = vld [vmem:[%s4411_s11 + $0x4c] sm:$0xf]  ;;  %v3042_v22 = vld [vmem:[%s4411_s11 + $0x338] sm:$0xf0]  ;;  %v2917_v34 = vor.u32 %v3730_v17, %v2914_v20 }
 0x12b   : > { %2251 = vmatpush.bf16.msra.mxu2 %v3013_v61  ;;  %2220 = vmatmul.bf16.vlgmr.msrb.gmra.mxu3 %v4878_v19  ;;  %v1988_v56 = vadd.f32 %v1987_v51, %v1975_v29  ;;  %v2674_v61 = vld [vmem:[%s4411_s11 + $0x58] sm:$0xf0]  ;;  %v3045_v41 = vor.u32 %v3762_v21, %v3042_v22  ;;  %v3818_v46 = vld [vmem:[%s4411_s11 + $0x4ec] sm:$0xf] }
 0x12c   : > { %2264 = vmatpush.bf16.msra.mxu3 %v3141_v1  ;;  %v2802_v1 = vld [vmem:[%s4411_s11 + $0x158] sm:$0xf0]  ;;  %v2677_v7 = vor.u32 %v3670_v60, %v2674_v61  ;;  %v3882_v50 = vld [vmem:[%s4411_s11 + $0x6ec] sm:$0xf] }
 0x12d   : > { %2226 = vmatpush.bf16.msra.mxu0 %v2741_v9  ;;  %v2000_v63 = vpop.f32.mrf.mxu2  ;;  %v2770_v37 = vld [vmem:[%s4411_s11 + $0x118] sm:$0xf0]  ;;  %v3914_v52 = vld [vmem:[%s4411_s11 + $0x7ec] sm:$0xf] }
 0x12e   : > { %2239 = vmatpush.bf16.msra.mxu1 %v2869_v10  ;;  %v2001_v4 = vadd.f32 %v2000_v63, %v1988_v56  ;;  %v2805_v10 = vor.u32 %v3702_v62, %v2802_v1  ;;  %v2898_v42 = vld [vmem:[%s4411_s11 + $0x218] sm:$0xf0]  ;;  %v2773_v51 = vor.u32 %v3694_v36, %v2770_v37  ;;  %v3878_v62 = vld [vmem:[%s4411_s11 + $0x6cc] sm:$0xf] }
 0x12f   : > { %2252 = vmatpush.bf16.msra.mxu2 %v2997_v11  ;;  %v2933_v11 = vor.u32 %v3734_v2, %v2930_v3  ;;  %v3026_v44 = vld [vmem:[%s4411_s11 + $0x318] sm:$0xf0]  ;;  %v3842_v26 = vld [vmem:[%s4411_s11 + $0x5ac] sm:$0xf] }
 0x130   : > { %2265 = vmatpush.bf16.msra.mxu3 %v3125_v14  ;;  %v2013_v5 = vpop.f32.mrf.mxu3  ;;  %v1976_v9 = vpop.f32.mrf.mxu0  ;;  %v3394_v49 = vld [vmem:[%s4411_s11 + $0x5f8] sm:$0xf0]  ;;  %v3029_v35 = vor.u32 %v3758_v43, %v3026_v44  ;;  %v4006_v17 = vld [vmem:[#allocation1 + $0x9] sm:$0xff] }
 0x131   : > { %2227 = vmatpush.bf16.msra.mxu0 %v2725_v24  ;;  %v4910_v8 = vadd.f32 %v2013_v5, %v2001_v4  ;;  %v1989_v14 = vpop.f32.mrf.mxu1  ;;  %v2661_v24 = vor.u32 %v3666_v33, %v2658_v12  ;;  %v3522_v29 = vld [vmem:[%s4411_s11 + $0x6f8] sm:$0xf0]  ;;  %v3810_v5 = vld [vmem:[%s4411_s11 + $0x4ac] sm:$0xf] }
 0x132   : > { %2240 = vmatpush.bf16.msra.mxu1 %v2853_v27  ;;  %v2642_v27 = vld [vmem:[%s4411_s11 + $0x18] sm:$0xf0]  ;;  %v3525_v56 = vor.u32 %v3882_v50, %v3522_v29  ;;  %v3906_v12 = vld [vmem:[%s4411_s11 + $0x7ac] sm:$0xf] }
 0x133   : > { %2253 = vmatpush.bf16.msra.mxu2 %v2981_v31  ;;  %v2789_v31 = vor.u32 %v3698_v13, %v2786_v16  ;;  %v2645_v28 = vor.u32 %v3662_v25, %v2642_v27  ;;  %v3650_v53 = vld [vmem:[%s4411_s11 + $0x7f8] sm:$0xf0]  ;;  %v4004_v14 = vld [vmem:[#allocation1] sm:$0xff] }
 0x134   : > { %2266 = vmatpush.bf16.msra.mxu3 %v3109_v38  ;;  %v3726_v38 = vld [vmem:[%s4411_s11 + $0x20c] sm:$0xf]  ;;  %v3653_v60 = vor.u32 %v3914_v52, %v3650_v53  ;;  %v3378_v61 = vld [vmem:[%s4411_s11 + $0x5d8] sm:$0xf0] }
 0x135   : > { %2228 = vmatpush.bf16.msra.mxu0 %v2709_v45  ;;  %v2002_v40 = vpop.f32.mrf.mxu2  ;;  %v3506_v63 = vld [vmem:[%s4411_s11 + $0x6d8] sm:$0xf0]  ;;  %v3806_v22 = vld [vmem:[%s4411_s11 + $0x48c] sm:$0xf] }
 0x136   : > { %2241 = vmatpush.bf16.msra.mxu1 %v2837_v47  ;;  %v3266_v47 = vld [vmem:[%s4411_s11 + $0x4f8] sm:$0xf0]  ;;  %v3509_v4 = vor.u32 %v3878_v62, %v3506_v63  ;;  %v3838_v25 = vld [vmem:[%s4411_s11 + $0x58c] sm:$0xf] }
 0x137   : > { %2254 = vmatpush.bf16.msra.mxu2 %v2965_v48  ;;  %v3850_v48 = vld [vmem:[%s4411_s11 + $0x5ec] sm:$0xf]  ;;  %v3269_v54 = vor.u32 %v3818_v46, %v3266_v47  ;;  %v3634_v1 = vld [vmem:[%s4411_s11 + $0x7d8] sm:$0xf0] }
 0x138   : > { %2267 = vmatpush.bf16.msra.mxu3 %v3093_v30  ;;  %v2015_v45 = vpop.f32.mrf.mxu3  ;;  %v2901_v30 = vor.u32 %v3726_v38, %v2898_v42  ;;  %v3397_v55 = vor.u32 %v3850_v48, %v3394_v49  ;;  %v3234_v6 = vld [vmem:[%s4411_s11 + $0x4b8] sm:$0xf0]  ;;  %v3902_v37 = vld [vmem:[%s4411_s11 + $0x78c] sm:$0xf] }
 0x139   : > { %2229 = vmatpush.bf16.msra.mxu0 %v2693_v57  ;;  %v3814_v57 = vld [vmem:[%s4411_s11 + $0x4cc] sm:$0xf]  ;;  %v4003_v9 = vld [vmem:[#allocation1 + $0x12] sm:$0xff]  ;;  %v3237_v16 = vor.u32 %v3810_v5, %v3234_v6 }
 0x13a   : > { %2242 = vmatpush.bf16.msra.mxu1 %v2821_v58  ;;  %v3250_v58 = vld [vmem:[%s4411_s11 + $0x4d8] sm:$0xf0]  ;;  %v3802_v44 = vld [vmem:[%s4411_s11 + $0x46c] sm:$0xf] }
 0x13b   : > { %2255 = vmatpush.bf16.msra.mxu2 %v2949_v59  ;;  %v3846_v59 = vld [vmem:[%s4411_s11 + $0x5cc] sm:$0xf]  ;;  %v3253_v2 = vor.u32 %v3814_v57, %v3250_v58  ;;  %v3490_v33 = vld [vmem:[%s4411_s11 + $0x6b8] sm:$0xf0] }
 0x13c   : > { %2268 = vmatpush.bf16.msra.mxu3 %v3077_v0  ;;  %v3910_v0 = vld [vmem:[%s4411_s11 + $0x7cc] sm:$0xf]  ;;  %v3381_v3 = vor.u32 %v3846_v59, %v3378_v61  ;;  %v3618_v13 = vld [vmem:[%s4411_s11 + $0x7b8] sm:$0xf0] }
 0x13d   : > { %2230 = vmatpush.bf16.msra.mxu0 %v2677_v7  ;;  %v3637_v7 = vor.u32 %v3910_v0, %v3634_v1  ;;  %v3621_v27 = vor.u32 %v3906_v12, %v3618_v13  ;;  %v3474_v36 = vld [vmem:[%s4411_s11 + $0x698] sm:$0xf0]  ;;  %v3834_v46 = vld [vmem:[%s4411_s11 + $0x56c] sm:$0xf] }
 0x13e   : > { %2243 = vmatpush.bf16.msra.mxu1 %v2805_v10  ;;  %v3362_v10 = vld [vmem:[%s4411_s11 + $0x5b8] sm:$0xf0]  ;;  %v3866_v49 = vld [vmem:[%s4411_s11 + $0x66c] sm:$0xf] }
 0x13f   : > { %2256 = vmatpush.bf16.msra.mxu2 %v2933_v11  ;;  %v3874_v11 = vld [vmem:[%s4411_s11 + $0x6ac] sm:$0xf]  ;;  %v3365_v20 = vor.u32 %v3842_v26, %v3362_v10  ;;  %v3602_v38 = vld [vmem:[%s4411_s11 + $0x798] sm:$0xf0] }
 0x140   : > { %2269 = vmatpush.bf16.msra.mxu3 %v3061_v15  ;;  %v4005_v15 = vld [vmem:[#allocation1 + $0x1b] sm:$0xff]  ;;  %v3493_v21 = vor.u32 %v3874_v11, %v3490_v33  ;;  %v3202_v45 = vld [vmem:[%s4411_s11 + $0x478] sm:$0xf0]  ;;  %v3605_v48 = vor.u32 %v3902_v37, %v3602_v38  ;;  %v3898_v29 = vld [vmem:[%s4411_s11 + $0x76c] sm:$0xf]  ;;  %v608_v37 = vperm.slane %v4829_v32, 1 }
 0x141   : > { %2231 = vmatpush.bf16.msra.mxu0 %v2661_v24  ;;  %v3218_v24 = vld [vmem:[%s4411_s11 + $0x498] sm:$0xf0]  ;;  %v3862_v59 = vld [vmem:[%s4411_s11 + $0x64c] sm:$0xf] }
 0x142   : > { %2244 = vmatpush.bf16.msra.mxu1 %v2789_v31  ;;  %v3346_v31 = vld [vmem:[%s4411_s11 + $0x598] sm:$0xf0]  ;;  %v3221_v40 = vor.u32 %v3806_v22, %v3218_v24  ;;  %v3894_v62 = vld [vmem:[%s4411_s11 + $0x74c] sm:$0xf] }
 0x143   : > { %2257 = vmatpush.bf16.msra.mxu2 %v2917_v34  ;;  %v3870_v34 = vld [vmem:[%s4411_s11 + $0x68c] sm:$0xf]  ;;  %v3349_v42 = vor.u32 %v3838_v25, %v3346_v31  ;;  %v3458_v50 = vld [vmem:[%s4411_s11 + $0x678] sm:$0xf0] }
 0x144   : > { %2270 = vmatpush.bf16.msra.mxu3 %v3045_v41  ;;  %v3477_v43 = vor.u32 %v3870_v34, %v3474_v36  ;;  %v3461_v53 = vor.u32 %v3866_v49, %v3458_v50  ;;  %v3314_v58 = vld [vmem:[%s4411_s11 + $0x558] sm:$0xf0]  ;;  %v3826_v6 = vld [vmem:[%s4411_s11 + $0x52c] sm:$0xf] }
 0x145   : > { %2232 = vmatpush.bf16.msra.mxu0 %v2645_v28  ;;  %v4960_v41 = vpop.f32.mrf.mxu0  ;;  %v3330_v28 = vld [vmem:[%s4411_s11 + $0x578] sm:$0xf0]  ;;  %v3858_v10 = vld [vmem:[%s4411_s11 + $0x62c] sm:$0xf] }
 0x146   : > { %2245 = vmatpush.bf16.msra.mxu1 %v2773_v51  ;;  %v4965_v47 = vpop.f32.mrf.mxu1  ;;  %v3586_v51 = vld [vmem:[%s4411_s11 + $0x778] sm:$0xf0]  ;;  %v3333_v52 = vor.u32 %v3834_v46, %v3330_v28  ;;  %v3890_v33 = vld [vmem:[%s4411_s11 + $0x72c] sm:$0xf] }
 0x147   : > { %2258 = vmatpush.bf16.msra.mxu2 %v2901_v30  ;;  %v3205_v30 = vor.u32 %v3802_v44, %v3202_v45  ;;  %v3589_v57 = vor.u32 %v3898_v29, %v3586_v51  ;;  %v3570_v63 = vld [vmem:[%s4411_s11 + $0x758] sm:$0xf0]  ;;  %v3854_v25 = vld [vmem:[%s4411_s11 + $0x60c] sm:$0xf]  ;;  %v2027_v45 = vadd.f32 %v4960_v41, %v608_v37 }
 0x148   : > { %2271 = vmatpush.bf16.msra.mxu3 %v3029_v35  ;;  %2233 = vmatmul.bf16.vlgmr.msra.gmra.mxu0 %v4004_v14  ;;  %v3798_v35 = vld [vmem:[%s4411_s11 + $0x44c] sm:$0xf]  ;;  %v3170_v5 = vld [vmem:[%s4411_s11 + $0x438] sm:$0xf0] }
 0x149   : > { %2277 = vmatpush.bf16.msrb.mxu0 %v3269_v54  ;;  %2246 = vmatmul.bf16.vlgmr.msra.gmra.mxu1 %v4006_v17  ;;  %v3186_v54 = vld [vmem:[%s4411_s11 + $0x458] sm:$0xf0]  ;;  %v3886_v34 = vld [vmem:[%s4411_s11 + $0x70c] sm:$0xf]  ;;  %v2040_v49 = vadd.f32 %v4965_v47, %v2027_v45 }
 0x14a   : > { %2290 = vmatpush.bf16.msrb.mxu1 %v3397_v55  ;;  %2259 = vmatmul.bf16.vlgmr.msra.gmra.mxu2 %v4003_v9  ;;  %v3830_v55 = vld [vmem:[%s4411_s11 + $0x54c] sm:$0xf]  ;;  %v3189_v0 = vor.u32 %v3798_v35, %v3186_v54  ;;  %v3298_v9 = vld [vmem:[%s4411_s11 + $0x538] sm:$0xf0] }
 0x14b   : > { %2303 = vmatpush.bf16.msrb.mxu2 %v3525_v56  ;;  %2272 = vmatmul.bf16.vlgmr.msra.gmra.mxu3 %v4005_v15  ;;  %v3426_v11 = vld [vmem:[%s4411_s11 + $0x638] sm:$0xf0]  ;;  %v3301_v14 = vor.u32 %v3826_v6, %v3298_v9  ;;  %v2349_v41 = vld [vmem:[%s5002_s10 + $0x68] sm:$0xff]  ;;  %v2364_v47 = vld [vmem:[%s5002_s10 + $0xe0] sm:$0xff] }
 0x14c   : > { %2316 = vmatpush.bf16.msrb.mxu3 %v3653_v60  ;;  %v3442_v60 = vld [vmem:[%s4411_s11 + $0x658] sm:$0xf0]  ;;  %v3429_v15 = vor.u32 %v3858_v10, %v3426_v11  ;;  %v2365_v29 = vld [vmem:[%s5002_s10 + $0xe8] sm:$0xff]  ;;  %v2372_v45 = vld [vmem:[%s5002_s10 + $0x120] sm:$0xff] }
 0x14d   : > { %2278 = vmatpush.bf16.msrb.mxu0 %v3253_v2  ;;  %v4975_v56 = vpop.f32.mrf.mxu2  ;;  %v2028_v1 = vpop.f32.mrf.mxu0  ;;  %v3317_v2 = vor.u32 %v3830_v55, %v3314_v58  ;;  %v3554_v12 = vld [vmem:[%s4411_s11 + $0x738] sm:$0xf0]  ;;  %v2361_v58 = vld [vmem:[%s5002_s10 + $0xc8] sm:$0xff] }
 0x14e   : > { %2291 = vmatpush.bf16.msrb.mxu1 %v3381_v3  ;;  %v4980_v61 = vpop.f32.mrf.mxu3  ;;  %v3445_v3 = vor.u32 %v3862_v59, %v3442_v60  ;;  %v2041_v26 = vpop.f32.mrf.mxu1  ;;  %v3154_v17 = vld [vmem:[%s4411_s11 + $0x418] sm:$0xf0]  ;;  %v3557_v22 = vor.u32 %v3890_v33, %v3554_v12  ;;  %v2344_v59 = vld [vmem:[%s5002_s10 + $0x40] sm:$0xff]  ;;  %v2341_v11 = vld [vmem:[%s5002_s10 + $0x28] sm:$0xff] }
 0x14f   : > { %2304 = vmatpush.bf16.msrb.mxu2 %v3509_v4  ;;  %v3794_v4 = vld [vmem:[%s4411_s11 + $0x42c] sm:$0xf]  ;;  %v3282_v24 = vld [vmem:[%s4411_s11 + $0x518] sm:$0xf0] }
 0x150   : > { %2317 = vmatpush.bf16.msrb.mxu3 %v3637_v7  ;;  %v3573_v7 = vor.u32 %v3894_v62, %v3570_v63  ;;  %v3173_v13 = vor.u32 %v3794_v4, %v3170_v5  ;;  %v3538_v36 = vld [vmem:[%s4411_s11 + $0x718] sm:$0xf0]  ;;  %v2360_v62 = vld [vmem:[%s5002_s10 + $0xc0] sm:$0xff]  ;;  %v2357_v33 = vld [vmem:[%s5002_s10 + $0xa8] sm:$0xff] }
 0x151   : > { %2279 = vmatpush.bf16.msrb.mxu0 %v3237_v16  ;;  %v3790_v16 = vld [vmem:[%s4411_s11 + $0x40c] sm:$0xf]  ;;  %v2351_v44 = vld [vmem:[%s5002_s10 + $0x78] sm:$0xff]  ;;  %v2366_v28 = vld [vmem:[%s5002_s10 + $0xf0] sm:$0xff] }
 0x152   : > { %2292 = vmatpush.bf16.msrb.mxu1 %v3365_v20  ;;  %v3822_v20 = vld [vmem:[%s4411_s11 + $0x50c] sm:$0xf]  ;;  %v3157_v38 = vor.u32 %v3790_v16, %v3154_v17  ;;  %v2367_v46 = vld [vmem:[%s5002_s10 + $0xf8] sm:$0xff]  ;;  %v2382_v51 = vld [vmem:[%s5002_s10 + $0x170] sm:$0xff] }
 0x153   : > { %2305 = vmatpush.bf16.msrb.mxu2 %v3493_v21  ;;  %v2383_v50 = vld [vmem:[%s5002_s10 + $0x178] sm:$0xff]  ;;  %v2362_v54 = vld [vmem:[%s5002_s10 + $0xd0] sm:$0xff]  ;;  %v2376_v26 = vld [vmem:[%s5002_s10 + $0x140] sm:$0xff] }
 0x154   : > { %2318 = vmatpush.bf16.msrb.mxu3 %v3621_v27  ;;  %v3410_v27 = vld [vmem:[%s4411_s11 + $0x618] sm:$0xf0] }
 0x155   : > { %2280 = vmatpush.bf16.msrb.mxu0 %v3221_v40  ;;  %v2054_v21 = vpop.f32.mrf.mxu2  ;;  %v3285_v40 = vor.u32 %v3822_v20, %v3282_v24  ;;  %v2379_v60 = vld [vmem:[%s5002_s10 + $0x158] sm:$0xff]  ;;  %v2342_v5 = vld [vmem:[%s5002_s10 + $0x30] sm:$0xff] }
 0x156   : > { %2293 = vmatpush.bf16.msrb.mxu1 %v3349_v42  ;;  %v2067_v31 = vpop.f32.mrf.mxu3  ;;  %v3413_v42 = vor.u32 %v3854_v25, %v3410_v27  ;;  %v2359_v4 = vld [vmem:[%s5002_s10 + $0xb8] sm:$0xff]  ;;  %v2338_v24 = vld [vmem:[%s5002_s10 + $0x10] sm:$0xff] }
 0x157   : > { %2306 = vmatpush.bf16.msrb.mxu2 %v3477_v43  ;;  %v3541_v43 = vor.u32 %v3886_v34, %v3538_v36  ;;  %v2375_v12 = vld [vmem:[%s5002_s10 + $0x138] sm:$0xff]  ;;  %v2354_v27 = vld [vmem:[%s5002_s10 + $0x90] sm:$0xff]  ;;  %v2337_v31 = vld [vmem:[%s5002_s10 + $0x8] sm:$0xff] }
 0x158   : > { %2319 = vmatpush.bf16.msrb.mxu3 %v3605_v48  ;;  %v2350_v48 = vld [vmem:[%s5002_s10 + $0x70] sm:$0xff]  ;;  %v2339_v20 = vld [vmem:[%s5002_s10 + $0x18] sm:$0xff]  ;;  %v2353_v34 = vld [vmem:[%s5002_s10 + $0x88] sm:$0xff] }
 0x159   : > { %2281 = vmatpush.bf16.msrb.mxu0 %v3205_v30  ;;  %v2381_v30 = vld [vmem:[%s5002_s10 + $0x168] sm:$0xff]  ;;  %v2336_v36 = vld [vmem:[%s5002_s10] sm:$0xff] }
 0x15a   : > { %2294 = vmatpush.bf16.msrb.mxu1 %v3333_v52  ;;  %v2346_v52 = vld [vmem:[%s5002_s10 + $0x50] sm:$0xff] }
 0x15b   : > { %2307 = vmatpush.bf16.msrb.mxu2 %v3461_v53 }
 0x15c   : > { %2320 = vmatpush.bf16.msrb.mxu3 %v3589_v57  ;;  %v2345_v57 = vld [vmem:[%s5002_s10 + $0x48] sm:$0xff] }
 0x15d   : > { %2282 = vmatpush.bf16.msrb.mxu0 %v3189_v0  ;;  %v2343_v0 = vld [vmem:[%s5002_s10 + $0x38] sm:$0xff] }
 0x15e   : > { %2295 = vmatpush.bf16.msrb.mxu1 %v3317_v2  ;;  %v2378_v2 = vld [vmem:[%s5002_s10 + $0x150] sm:$0xff] }
 0x15f   : > { %2308 = vmatpush.bf16.msrb.mxu2 %v3445_v3  ;;  %v2377_v3 = vld [vmem:[%s5002_s10 + $0x148] sm:$0xff] }
 0x160   : > { %2321 = vmatpush.bf16.msrb.mxu3 %v3573_v7  ;;  %v2358_v7 = vld [vmem:[%s5002_s10 + $0xb0] sm:$0xff] }
 0x161   : > { %2283 = vmatpush.bf16.msrb.mxu0 %v3173_v13  ;;  %v2340_v13 = vld [vmem:[%s5002_s10 + $0x20] sm:$0xff] }
 0x162   : > { %2296 = vmatpush.bf16.msrb.mxu1 %v3301_v14  ;;  %v2374_v14 = vld [vmem:[%s5002_s10 + $0x130] sm:$0xff] }
 0x163   : > { %2309 = vmatpush.bf16.msrb.mxu2 %v3429_v15  ;;  %v2356_v15 = vld [vmem:[%s5002_s10 + $0xa0] sm:$0xff] }
 0x164   : > { %2322 = vmatpush.bf16.msrb.mxu3 %v3557_v22  ;;  %v2355_v22 = vld [vmem:[%s5002_s10 + $0x98] sm:$0xff] }
 0x165   : > { %2284 = vmatpush.bf16.msrb.mxu0 %v3157_v38  ;;  %v2078_v53 = vpop.f32.mrf.mxu0  ;;  %v2352_v38 = vld [vmem:[%s5002_s10 + $0x80] sm:$0xff] }
 0x166   : > { %2297 = vmatpush.bf16.msrb.mxu1 %v3285_v40  ;;  %v2091_v55 = vpop.f32.mrf.mxu1  ;;  %v2329_v40 = vmax.f32 %v4910_v8, 0.0  ;;  %v2370_v8 = vld [vmem:[%s5002_s10 + $0x110] sm:$0xff] }
 0x167   : > { %2310 = vmatpush.bf16.msrb.mxu2 %v3413_v42  ;;  %v2373_v42 = vld [vmem:[%s5002_s10 + $0x128] sm:$0xff] }
 0x168   : > { %2323 = vmatpush.bf16.msrb.mxu3 %v3541_v43  ;;  %2285 = vmatmul.bf16.vlgmr.msrb.gmra.mxu0 %v4875_v18  ;;  %v2348_v18 = vld [vmem:[%s5002_s10 + $0x60] sm:$0xff] }
 0x169   : > { %2400 = vmatpush.msra.mxu0 %v2351_v44  ;;  %2298 = vmatmul.bf16.vlgmr.msrb.gmra.mxu1 %v4883_v23  ;;  %v2053_v23 = vadd.f32 %v4975_v56, %v2040_v49  ;;  %v2380_v56 = vld [vmem:[%s5002_s10 + $0x160] sm:$0xff] }
 0x16a   : > { %2420 = vmatpush.msra.mxu1 %v2367_v46  ;;  %2311 = vmatmul.bf16.vlgmr.msrb.gmra.mxu2 %v4869_v39  ;;  %v2347_v39 = vld [vmem:[%s5002_s10 + $0x58] sm:$0xff] }
 0x16b   : > { %2324 = vmatmul.bf16.vlgmr.msrb.gmra.mxu3 %v4878_v19  ;;  %2401 = vmatpush.msra.mxu0 %v2350_v48  ;;  %v2363_v19 = vld [vmem:[%s5002_s10 + $0xd8] sm:$0xff]  ;;  %v2066_v35 = vadd.f32 %v4980_v61, %v2053_v23 }
 0x16c   : > { %2421 = vmatpush.msra.mxu1 %v2366_v28  ;;  %2440 = vmatpush.msra.mxu2 %v2383_v50  ;;  %v2371_v46 = vld [vmem:[%s5002_s10 + $0x118] sm:$0xff]  ;;  %v2369_v50 = vld [vmem:[%s5002_s10 + $0x108] sm:$0xff] }
 0x16d   : > { %2402 = vmatpush.msra.mxu0 %v2349_v41  ;;  %v2079_v61 = vadd.f32 %v2078_v53, %v2066_v35  ;;  %v2104_v63 = vpop.f32.mrf.mxu2  ;;  %v2080_v6 = vpop.f32.mrf.mxu0 }
 0x16e   : > { %2422 = vmatpush.msra.mxu1 %v2365_v29  ;;  %2441 = vmatpush.msra.mxu2 %v2382_v51  ;;  %v2117_v1 = vpop.f32.mrf.mxu3  ;;  %v2093_v10 = vpop.f32.mrf.mxu1  ;;  %v2368_v29 = vld [vmem:[%s5002_s10 + $0x100] sm:$0xff]  ;;  %v609_v51 = vperm.slane %v4829_v32, 2 }
 0x16f   : > { %2403 = vmatpush.msra.mxu0 %v2348_v18  ;;  %v2092_v9 = vadd.f32 %v2091_v55, %v2079_v61  ;;  %v2399_v55 = vld [vmem:[%s5002_s10 + $0x1f8] sm:$0xff]  ;;  %v2396_v61 = vld [vmem:[%s5002_s10 + $0x1e0] sm:$0xff] }
 0x170   : > { %2423 = vmatpush.msra.mxu1 %v2364_v47  ;;  %2442 = vmatpush.msra.mxu2 %v2381_v30  ;;  %v2392_v6 = vld [vmem:[%s5002_s10 + $0x1c0] sm:$0xff] }
 0x171   : > { %2404 = vmatpush.msra.mxu0 %v2347_v39  ;;  %v2105_v16 = vadd.f32 %v2104_v63, %v2092_v9  ;;  %2460 = vmatpush.msra.mxu3 %v2399_v55  ;;  %v2389_v9 = vld [vmem:[%s5002_s10 + $0x1a8] sm:$0xff] }
 0x172   : > { %2424 = vmatpush.msra.mxu1 %v2363_v19  ;;  %2443 = vmatpush.msra.mxu2 %v2380_v56 }
 0x173   : > { %2405 = vmatpush.msra.mxu0 %v2346_v52  ;;  %v2118_v25 = vadd.f32 %v2117_v1, %v2105_v16  ;;  %v2395_v1 = vld [vmem:[%s5002_s10 + $0x1d8] sm:$0xff] }
 0x174   : > { %2425 = vmatpush.msra.mxu1 %v2362_v54  ;;  %2444 = vmatpush.msra.mxu2 %v2379_v60 }
 0x175   : > { %2406 = vmatpush.msra.mxu0 %v2345_v57  ;;  %v2106_v17 = vpop.f32.mrf.mxu2  ;;  %v2330_v37 = vmax.f32 %v2118_v25, 0.0 }
 0x176   : > { %2426 = vmatpush.msra.mxu1 %v2361_v58  ;;  %2445 = vmatpush.msra.mxu2 %v2378_v2  ;;  %v2119_v21 = vpop.f32.mrf.mxu3  ;;  %v2398_v58 = vld [vmem:[%s5002_s10 + $0x1f0] sm:$0xff]  ;;  %v2385_v17 = vld [vmem:[%s5002_s10 + $0x188] sm:$0xff] }
 0x177   : > { %2407 = vmatpush.msra.mxu0 %v2344_v59  ;;  %v2397_v59 = vld [vmem:[%s5002_s10 + $0x1e8] sm:$0xff]  ;;  %2461 = vmatpush.msra.mxu3 %v2398_v58  ;;  %v2394_v2 = vld [vmem:[%s5002_s10 + $0x1d0] sm:$0xff] }
 0x178   : > { %2427 = vmatpush.msra.mxu1 %v2360_v62  ;;  %2446 = vmatpush.msra.mxu2 %v2377_v3 }
 0x179   : > { %2408 = vmatpush.msra.mxu0 %v2343_v0  ;;  %2462 = vmatpush.msra.mxu3 %v2397_v59 }
 0x17a   : > { %2428 = vmatpush.msra.mxu1 %v2359_v4  ;;  %2447 = vmatpush.msra.mxu2 %v2376_v26  ;;  %v2391_v26 = vld [vmem:[%s5002_s10 + $0x1b8] sm:$0xff] }
 0x17b   : > { %2409 = vmatpush.msra.mxu0 %v2342_v5  ;;  %2463 = vmatpush.msra.mxu3 %v2396_v61  ;;  %v2393_v5 = vld [vmem:[%s5002_s10 + $0x1c8] sm:$0xff] }
 0x17c   : > { %2429 = vmatpush.msra.mxu1 %v2358_v7  ;;  %2448 = vmatpush.msra.mxu2 %v2375_v12  ;;  %v2390_v7 = vld [vmem:[%s5002_s10 + $0x1b0] sm:$0xff]  ;;  %v2387_v12 = vld [vmem:[%s5002_s10 + $0x198] sm:$0xff] }
 0x17d   : > { %2410 = vmatpush.msra.mxu0 %v2341_v11  ;;  %2464 = vmatpush.msra.mxu3 %v2395_v1  ;;  %v2388_v11 = vld [vmem:[%s5002_s10 + $0x1a0] sm:$0xff] }
 0x17e   : > { %2430 = vmatpush.msra.mxu1 %v2357_v33  ;;  %2449 = vmatpush.msra.mxu2 %v2374_v14 }
 0x17f   : > { %2411 = vmatpush.msra.mxu0 %v2340_v13  ;;  %2465 = vmatpush.msra.mxu3 %v2394_v2 }
 0x180   : > { %2431 = vmatpush.msra.mxu1 %v2356_v15  ;;  %2450 = vmatpush.msra.mxu2 %v2373_v42  ;;  %v2386_v15 = vld [vmem:[%s5002_s10 + $0x190] sm:$0xff] }
 0x181   : > { %2412 = vmatpush.msra.mxu0 %v2339_v20  ;;  %2466 = vmatpush.msra.mxu3 %v2393_v5  ;;  %v2384_v20 = vld [vmem:[%s5002_s10 + $0x180] sm:$0xff] }
 0x182   : > { %2432 = vmatpush.msra.mxu1 %v2355_v22  ;;  %2451 = vmatpush.msra.mxu2 %v2372_v45  ;;  %v4007_v22 = vld [vmem:[%s4417_s8] sm:$0xf] }
 0x183   : > { %2413 = vmatpush.msra.mxu0 %v2338_v24  ;;  %2467 = vmatpush.msra.mxu3 %v2392_v6  ;;  %v610_v24 = vperm.slane %v4007_v22, 3 }
 0x184   : > { %2433 = vmatpush.msra.mxu1 %v2354_v27  ;;  %2452 = vmatpush.msra.mxu2 %v2371_v46 }
 0x185   : > { %2414 = vmatpush.msra.mxu0 %v2337_v31  ;;  %v2130_v43 = vpop.f32.mrf.mxu0  ;;  %2468 = vmatpush.msra.mxu3 %v2391_v26 }
 0x186   : > { %2434 = vmatpush.msra.mxu1 %v2353_v34  ;;  %v2143_v44 = vpop.f32.mrf.mxu1  ;;  %2453 = vmatpush.msra.mxu2 %v2370_v8  ;;  %v2131_v23 = vadd.f32 %v2130_v43, %v609_v51 }
 0x187   : > { %2415 = vmatpush.msra.mxu0 %v2336_v36  ;;  %2469 = vmatpush.msra.mxu3 %v2390_v7 }
 0x188   : > { %2435 = vmatpush.msra.mxu1 %v2352_v38  ;;  %2416 = vmatmul.f32.vlgmr.msra.gmra.mxu0 %v2329_v40  ;;  %v2144_v39 = vadd.f32 %v2143_v44, %v2131_v23 }
 0x189   : > { %2436 = vmatmul.f32.vlgmr.msra.gmra.mxu1 %v2330_v37  ;;  %2454 = vmatpush.msra.mxu2 %v2369_v50 }
 0x18a   : > { %2470 = vmatpush.msra.mxu3 %v2389_v9 }
 0x18b   : > { %2455 = vmatpush.msra.mxu2 %v2368_v29 }
 0x18c   : > { %2471 = vmatpush.msra.mxu3 %v2388_v11 }
 0x18d   : > { %v2156_v48 = vpop.f32.mrf.mxu2  ;;  %v2132_v49 = vpop.f32.mrf.mxu0 }
 0x18e   : > { %v2169_v28 = vpop.f32.mrf.mxu3  ;;  %v2145_v41 = vpop.f32.mrf.mxu1  ;;  %v2157_v19 = vadd.f32 %v2156_v48, %v2144_v39  ;;  %2472 = vmatpush.msra.mxu3 %v2387_v12  ;;  %v2333_v39 = vld [vmem:[#allocation2] sm:$0x3] }
 0x190   : > { %v2170_v30 = vadd.f32 %v2169_v28, %v2157_v19  ;;  %2473 = vmatpush.msra.mxu3 %v2386_v15 }
 0x192   : > { %2474 = vmatpush.msra.mxu3 %v2385_v17 }
 0x194   : > { %2475 = vmatpush.msra.mxu3 %v2384_v20 }
 0x195   : > { %v2158_v18 = vpop.f32.mrf.mxu2 }
 0x196   : > { %v2171_v47 = vpop.f32.mrf.mxu3 }
 0x1a5   : > { %v2182_v52 = vpop.f32.mrf.mxu0 }
 0x1a6   : > { %v2183_v53 = vadd.f32 %v2182_v52, %v2170_v30  ;;  %v2195_v35 = vpop.f32.mrf.mxu1 }
 0x1a8   : > { %v2196_v54 = vadd.f32 %v2195_v35, %v2183_v53 }
 0x1ad   : > { %v2208_v56 = vpop.f32.mrf.mxu2  ;;  %v2184_v62 = vpop.f32.mrf.mxu0 }
 0x1ae   : > { %v2209_v32 = vadd.f32 %v2208_v56, %v2196_v54  ;;  %v2221_v57 = vpop.f32.mrf.mxu3  ;;  %v2197_v63 = vpop.f32.mrf.mxu1 }
 0x1b0   : > { %v2222_v60 = vadd.f32 %v2221_v57, %v2209_v32 }
 0x1b2   : > { %v2331_v0 = vmax.f32 %v2222_v60, 0.0 }
 0x1b4   : > { %2456 = vmatmul.f32.vlgmr.msra.gmra.mxu2 %v2331_v0 }
 0x1b5   : > { %v2210_v3 = vpop.f32.mrf.mxu2 }
 0x1b6   : > { %v2223_v4 = vpop.f32.mrf.mxu3 }
 0x1c5   : > { %v2234_v10 = vpop.f32.mrf.mxu0 }
 0x1c6   : > { %v2247_v33 = vpop.f32.mrf.mxu1  ;;  %v2235_v31 = vadd.f32 %v2234_v10, %v610_v24 }
 0x1c8   : > { %v2248_v34 = vadd.f32 %v2247_v33, %v2235_v31 }
 0x1cd   : > { %v2260_v13 = vpop.f32.mrf.mxu2  ;;  %v2236_v16 = vpop.f32.mrf.mxu0 }
 0x1ce   : > { %v2273_v14 = vpop.f32.mrf.mxu3  ;;  %v2249_v21 = vpop.f32.mrf.mxu1  ;;  %v2261_v36 = vadd.f32 %v2260_v13, %v2248_v34 }
 0x1d0   : > { %v2274_v37 = vadd.f32 %v2273_v14, %v2261_v36 }
 0x1d5   : > { %v2262_v25 = vpop.f32.mrf.mxu2 }
 0x1d6   : > { %v2275_v27 = vpop.f32.mrf.mxu3 }
 0x1e5   : > { %v2286_v38 = vpop.f32.mrf.mxu0 }
 0x1e6   : > { %v2299_v40 = vpop.f32.mrf.mxu1  ;;  %v2287_v42 = vadd.f32 %v2286_v38, %v2274_v37 }
 0x1e8   : > { %v2300_v43 = vadd.f32 %v2299_v40, %v2287_v42 }
 0x1ed   : > { %v2312_v44 = vpop.f32.mrf.mxu2  ;;  %v2288_v48 = vpop.f32.mrf.mxu0 }
 0x1ee   : > { %v2313_v45 = vadd.f32 %v2312_v44, %v2300_v43  ;;  %v2325_v46 = vpop.f32.mrf.mxu3  ;;  %v2301_v28 = vpop.f32.mrf.mxu1 }
 0x1f0   : > { %v2326_v49 = vadd.f32 %v2325_v46, %v2313_v45 }
 0x1f2   : > { %v2332_v8 = vmax.f32 %v2326_v49, 0.0 }
 0x1f4   : > { %2476 = vmatmul.f32.vlgmr.msra.gmra.mxu3 %v2332_v8 }
 0x1f5   : > { %v2314_v50 = vpop.f32.mrf.mxu2 }
 0x1f6   : > { %v2327_v41 = vpop.f32.mrf.mxu3 }
 0x205   : > { %v2417_v29 = vpop.f32.mrf.mxu0 }
 0x206   : > { %v2437_v51 = vpop.f32.mrf.mxu1 }
 0x207   : > { %v2438_v47 = vadd.f32 %v2437_v51, %v2417_v29 }
 0x237   : > { %v2457_v18 = vpop.f32.mrf.mxu2 }
 0x238   : > { %v2458_v23 = vadd.f32 %v2457_v18, %v2438_v47 }
 0x277   : > { %v2477_v19 = vpop.f32.mrf.mxu3 }
 0x278   : > { %v2478_v30 = vadd.f32 %v2477_v19, %v2458_v23  ;;  %2485 = sbr.rel (%p3655_p1) target bundleno = 645 (0x285), region = 68 }
 0x27a   : > { %v2480_v52 = vadd.f32 %v2478_v30, %v2333_v39 }
 0x27c   : > { %2481 = vst [vmem:[#allocation2] sm:$0x3] %v2480_v52 }
 0x283   : > { %v2486_v53 = vld [vmem:[#allocation2] sm:$0x3] }
 0x284   : > { %2487 = vst [vmem:[#allocation12] sm:$0x3] %v2486_v53 }
 0x285 PF: > { %p3957_p4 = scmp.eq.s32.totalorder %s4290_s22, 4  ;;  %s4240_s16 = smov [#allocation12]  }
 0x286   : > { %s2494_s14 = sshll.u32 %s4240_s16, 4  ;;  %s2496_s13 = sshll.u32 %s5102_s5, 4  ;;  %s2495_s14 = int_to_ptr.vmem [resolvable:$true] %s2494_s14  ;;  %s2497_s13 = int_to_ptr.hbm [resolvable:$true] %s2496_s13 }
 0x287   : > { %3932 = dma.vmem_to_hbm [thread:$0]  (%p3957_p4), %s2495_s14, 32, %s2497_s13, [#allocation5]  }
 0x288   : > { %4215 = dma.done.wait (%p3957_p4), [#allocation5], 32  }
 0x289   : > { %4217 = vsyncadd (%p3957_p4), [#allocation5], 4294967264 }
 0x28a PF: > { %s5112_s3 = sld [smem:[#allocation17_spill]]  ;;  %p20_p5 = scmp.ge.s32.totalorder %s4319_s6, 7  }
 0x28b   : > { %s5113_s18 = smov %s4224_s19  ;;  %s5114_s19 = smov %s4228_s20 }
 0x28c   : > { %s5116_s21 = smov %s4319_s6  ;;  %22 = sbr.rel (!%p20_p5) target bundleno = 10 (0xa), region = 118 }
 0x290   : > { %s5115_s20 = smov %s5112_s3 }
 0x291   :  { %2510 = vsyncpa [#allocation4], 1 }
 0x292   :  { %2512 = vsyncpa [#allocation4 + $0x1], 1 }
 0x293   :  { %2513 = vsyncpa [#allocation7], 1 }
 0x294   :  { %2515 = vsyncpa [#allocation7 + $0x1], 1 }
 0x295   :  { %2516 = vsyncpa [#allocation10], 1 }
 0x296   :  { %2517 = vsyncpa [#allocation5], 1 }
 0x297   :  { %2519 = vsyncpa [#allocation5 + $0x1], 1 }

</bundles_post_ra>
